<compile_context>
chip_gen: v7x
topology: tpu7x:2x2x1
jax: 0.10.0
libtpu: 0.0.40
codegen_flags: <defaults>
</compile_context>

<pallas_src>
import math

import jax
import jax.numpy as jnp
from jax.experimental import pallas as pl
from jax.experimental.pallas import tpu as pltpu

# ----------------------- synthetic small-BERT config -----------------------
VOCAB = 100
MAX_POS = 16
TYPE_VOCAB = 2
HIDDEN = 32
NUM_HEADS = 2
HEAD_DIM = HIDDEN // NUM_HEADS
INTERMEDIATE = 64
NUM_LAYERS = 2
NUM_LABELS = 4
LN_EPS = 1e-12
QKV_PAD = 128            # fused QKV output lanes padded 3*HIDDEN=96 -> 128


# ------------------------------ BlockSpecs -----------------------------------
def _batch_spec(shape):
    """Per-example block: size 1 along the leading (batch) axis."""
    zeros = (0,) * (len(shape) - 1)
    return pl.BlockSpec((1,) + tuple(shape[1:]), lambda b, z=zeros: (b,) + z)


def _const_spec(shape):
    """Whole-array block, identical at every grid step (weights stay resident)."""
    zeros = (0,) * len(shape)
    return pl.BlockSpec(tuple(shape), lambda b, z=zeros: z)


# ------------------------------ fused kernel --------------------------------
def bert_kernel(
    emb_ref, mask_ref, labels_ref,
    eg_ref, eb_ref,
    qkv_w_ref, qkv_b_ref, ao_w_ref, ao_b_ref,
    ln1_g_ref, ln1_b_ref, i_w_ref, i_b_ref, o_w_ref, o_b_ref,
    ln2_g_ref, ln2_b_ref,
    pool_w_ref, pool_b_ref, cls_w_ref, cls_b_ref,
    logits_ref, loss_ref,
):
    f32 = jnp.float32
    bf16 = jnp.bfloat16

    def layer_norm(x, g, b):
        mu = jnp.mean(x, axis=-1, keepdims=True)
        var = jnp.mean((x - mu) * (x - mu), axis=-1, keepdims=True)
        return (x - mu) * jax.lax.rsqrt(var + LN_EPS) * g + b

    def mm(a, w):
        # bf16 MXU operands, f32 accumulation (native on v5e/v6e/v7x).
        return jnp.dot(a.astype(bf16), w.astype(bf16), preferred_element_type=f32)

    # --- embeddings LayerNorm (one example: (S, H)) ---
    h = layer_norm(emb_ref[0], eg_ref[...], eb_ref[...])          # (S, H) f32
    mask = mask_ref[0]                                            # (1, S) additive bias

    # --- encoder layers (NUM_LAYERS=2: static unroll is fine; use fori_loop
    #     or a grid axis if the layer count grows) ---
    for l in range(NUM_LAYERS):
        # fused QKV projection, lane-padded to 128 output columns;
        # the 1/sqrt(HEAD_DIM) scale is pre-folded into the Q columns.
        qkv = mm(h, qkv_w_ref[l]) + qkv_b_ref[l]                  # (S, 128) f32

        ctx_heads = []
        for hd in range(NUM_HEADS):
            c0 = hd * HEAD_DIM
            q = qkv[:, c0:c0 + HEAD_DIM]                          # (S, Dh)
            k = qkv[:, HIDDEN + c0:HIDDEN + c0 + HEAD_DIM]
            v = qkv[:, 2 * HIDDEN + c0:2 * HIDDEN + c0 + HEAD_DIM]
            s = jax.lax.dot_general(
                q.astype(bf16), k.astype(bf16), (((1,), (1,)), ((), ())),
                preferred_element_type=f32) + mask                # (S, S)
            e = jnp.exp(s - jnp.max(s, axis=-1, keepdims=True))
            p = e * pl.reciprocal(jnp.sum(e, axis=-1, keepdims=True), approx=True)
            ctx_heads.append(mm(p, v))                            # (S, Dh)

        ctx = jnp.concatenate(ctx_heads, axis=-1)                 # (S, H)
        attn_out = mm(ctx, ao_w_ref[l]) + ao_b_ref[l]             # (S, H)
        h = layer_norm(attn_out + h, ln1_g_ref[l], ln1_b_ref[l])

        inter = mm(h, i_w_ref[l]) + i_b_ref[l]                    # (S, 4H)
        # TODO(synk): HF/PyTorch BERT default is exact erf-GELU; tanh approximation here.
        inter = 0.5 * inter * (1.0 + jnp.tanh(
            0.7978845608028654 * (inter + 0.044715 * inter * inter * inter)))
        ffn = mm(inter, o_w_ref[l]) + o_b_ref[l]                  # (S, H)
        h = layer_norm(ffn + h, ln2_g_ref[l], ln2_b_ref[l])

    # --- pooler (dense + tanh on the [CLS] token = row 0) + classifier ---
    cls_tok = h[0:1, :]                                           # (1, H)
    pooled = jnp.tanh(mm(cls_tok, pool_w_ref[...]) + pool_b_ref[...])
    logits = mm(pooled, cls_w_ref[...]) + cls_b_ref[...]          # (1, NL)
    logits_ref[0] = logits

    # --- per-example partial of BCEWithLogitsLoss (mean taken outside) ---
    y = labels_ref[0]                                             # (1, NL)
    per = (jnp.maximum(logits, 0.0) - logits * y
           + jnp.log(1.0 + jnp.exp(-jnp.abs(logits))))
    loss_ref[0] = jnp.sum(per, axis=-1, keepdims=True)            # (1, 1)


# ------------------------- wrapper / weight prep -----------------------------
def _kernel_weights(p):
    """Trace-time weight prep: fold the softmax scale into the Q columns of the
    fused QKV weight/bias, pad the QKV output lanes 96->128, and cast all
    matmul weights to bf16 (biases / LayerNorm params stay f32)."""
    f32, bf16 = jnp.float32, jnp.bfloat16
    scale = 1.0 / math.sqrt(HEAD_DIM)
    qkv_w = p["qkv_w"].at[:, :, :HIDDEN].multiply(scale)
    qkv_b = p["qkv_b"].at[:, :, :HIDDEN].multiply(scale)
    pad = ((0, 0), (0, 0), (0, QKV_PAD - 3 * HIDDEN))
    qkv_w = jnp.pad(qkv_w, pad).astype(bf16)
    qkv_b = jnp.pad(qkv_b, pad).astype(f32)
    return (
        p["emb_ln_g"], p["emb_ln_b"],
        qkv_w, qkv_b,
        p["ao_w"].astype(bf16), p["ao_b"],
        p["ln1_g"], p["ln1_b"],
        p["i_w"].astype(bf16), p["i_b"],
        p["o_w"].astype(bf16), p["o_b"],
        p["ln2_g"], p["ln2_b"],
        p["pool_w"].astype(bf16), p["pool_b"],
        p["cls_w"].astype(bf16), p["cls_b"],
    )


def bert_forward_pallas(emb, mask, labels, params):
    B = emb.shape[0]
    weights = _kernel_weights(params)
    inputs = (emb, mask, labels) + weights
    in_specs = ([_batch_spec(emb.shape), _batch_spec(mask.shape),
                 _batch_spec(labels.shape)]
                + [_const_spec(w.shape) for w in weights])
    out_shape = (jax.ShapeDtypeStruct((B, 1, NUM_LABELS), jnp.float32),
                 jax.ShapeDtypeStruct((B, 1, 1), jnp.float32))
    out_specs = [_batch_spec((B, 1, NUM_LABELS)), _batch_spec((B, 1, 1))]

    logits3, loss_part = pl.pallas_call(
        bert_kernel,
        grid=(B,),
        in_specs=in_specs,
        out_specs=out_specs,
        out_shape=out_shape,
        compiler_params=pltpu.CompilerParams(dimension_semantics=("parallel",)),
    )(*inputs)
    return logits3.reshape(B, NUM_LABELS), loss_part


# ------------------------------ model glue ----------------------------------
def init_params(key):
    keys = iter(jax.random.split(key, 16))

    def w(shape):
        return jax.random.normal(next(keys), shape, jnp.float32) * 0.02

    def zeros(shape):
        return jnp.zeros(shape, jnp.float32)

    def ones(shape):
        return jnp.ones(shape, jnp.float32)

    L = NUM_LAYERS
    return {
        "word_emb": w((VOCAB, HIDDEN)),
        "pos_emb": w((MAX_POS, HIDDEN)),
        "type_emb": w((TYPE_VOCAB, HIDDEN)),
        "emb_ln_g": ones((1, HIDDEN)), "emb_ln_b": zeros((1, HIDDEN)),
        # per-layer weights stacked along a leading layer axis
        "qkv_w": w((L, HIDDEN, 3 * HIDDEN)), "qkv_b": zeros((L, 1, 3 * HIDDEN)),
        "ao_w": w((L, HIDDEN, HIDDEN)), "ao_b": zeros((L, 1, HIDDEN)),
        "ln1_g": ones((L, 1, HIDDEN)), "ln1_b": zeros((L, 1, HIDDEN)),
        "i_w": w((L, HIDDEN, INTERMEDIATE)), "i_b": zeros((L, 1, INTERMEDIATE)),
        "o_w": w((L, INTERMEDIATE, HIDDEN)), "o_b": zeros((L, 1, HIDDEN)),
        "ln2_g": ones((L, 1, HIDDEN)), "ln2_b": zeros((L, 1, HIDDEN)),
        "pool_w": w((HIDDEN, HIDDEN)), "pool_b": zeros((1, HIDDEN)),
        "cls_w": w((HIDDEN, NUM_LABELS)), "cls_b": zeros((1, NUM_LABELS)),
    }


def multi_label_bert_forward(params, input_ids, attention_mask, labels=None):
    B, S = input_ids.shape

    # --- embeddings: gathers in plain-JAX glue; LayerNorm inside the kernel ---
    word = jnp.take(params["word_emb"], input_ids, axis=0)         # (B, S, H)
    pos = params["pos_emb"][:S][None, :, :]                        # (1, S, H)
    typ = params["type_emb"][0][None, None, :]                     # token_type_ids = 0
    emb = (word + pos + typ).astype(jnp.float32)                   # (B, S, H)

    # --- additive attention mask, passed un-broadcast as (B, 1, S) ---
    mask = ((1.0 - attention_mask.astype(jnp.float32)) * -1e9)[:, None, :]

    have_labels = labels is not None
    lab = (labels.astype(jnp.float32) if have_labels
           else jnp.zeros((B, NUM_LABELS), jnp.float32)).reshape(B, 1, NUM_LABELS)

    logits, loss_part = bert_forward_pallas(emb, mask, lab, params)
    loss = (jnp.sum(loss_part) / float(B * NUM_LABELS)) if have_labels else None
    return {"loss": loss, "logits": logits}


# ---------------------------------- main ------------------------------------
if __name__ == "__main__":
    key = jax.random.PRNGKey(0)
    pkey, ikey, lkey = jax.random.split(key, 3)

    params = init_params(pkey)

    B, S = 2, 8
    input_ids = jax.random.randint(ikey, (B, S), 0, VOCAB, dtype=jnp.int32)
    attention_mask = jnp.ones((B, S), jnp.int32).at[1, 6:].set(0)   # pad last 2 of row 1
    labels = jax.random.bernoulli(lkey, 0.5, (B, NUM_LABELS)).astype(jnp.float32)

    out = multi_label_bert_forward(params, input_ids, attention_mask, labels)
    jax.block_until_ready(out["logits"])
    jax.block_until_ready(out["loss"])
    assert out["logits"].shape == (B, NUM_LABELS)
    assert out["loss"].shape == ()
    print("KERNEL_OK")
</pallas_src>

<mosaic_0001>
module attributes {stable_mosaic.version = 11 : i64} {
  func.func @bert_kernel(%arg0: i32, %arg1: memref<1x8x32xf32, #tpu.memory_space<vmem>>, %arg2: memref<1x1x8xf32, #tpu.memory_space<vmem>>, %arg3: memref<1x1x4xf32, #tpu.memory_space<vmem>>, %arg4: memref<1x32xf32, #tpu.memory_space<vmem>>, %arg5: memref<1x32xf32, #tpu.memory_space<vmem>>, %arg6: memref<2x32x128xbf16, #tpu.memory_space<vmem>>, %arg7: memref<2x1x128xf32, #tpu.memory_space<vmem>>, %arg8: memref<2x32x32xbf16, #tpu.memory_space<vmem>>, %arg9: memref<2x1x32xf32, #tpu.memory_space<vmem>>, %arg10: memref<2x1x32xf32, #tpu.memory_space<vmem>>, %arg11: memref<2x1x32xf32, #tpu.memory_space<vmem>>, %arg12: memref<2x32x64xbf16, #tpu.memory_space<vmem>>, %arg13: memref<2x1x64xf32, #tpu.memory_space<vmem>>, %arg14: memref<2x64x32xbf16, #tpu.memory_space<vmem>>, %arg15: memref<2x1x32xf32, #tpu.memory_space<vmem>>, %arg16: memref<2x1x32xf32, #tpu.memory_space<vmem>>, %arg17: memref<2x1x32xf32, #tpu.memory_space<vmem>>, %arg18: memref<32x32xbf16, #tpu.memory_space<vmem>>, %arg19: memref<1x32xf32, #tpu.memory_space<vmem>>, %arg20: memref<32x4xbf16, #tpu.memory_space<vmem>>, %arg21: memref<1x4xf32, #tpu.memory_space<vmem>>, %arg22: memref<1x1x4xf32, #tpu.memory_space<vmem>>, %arg23: memref<1x1x1xf32, #tpu.memory_space<vmem>>) attributes {dimension_semantics = [#tpu.dimension_semantics<parallel>], iteration_bounds = array<i64: 2>, scalar_prefetch = 0 : i64, scratch_operands = 0 : i64, tpu.core_type = #tpu.core_type<tc>, window_params = [{transform_indices = @transform_0, window_bounds = array<i64: 1, 8, 32>}, {transform_indices = @transform_1, window_bounds = array<i64: 1, 1, 8>}, {transform_indices = @transform_2, window_bounds = array<i64: 1, 1, 4>}, {pipeline_mode = #tpu.pipeline_mode<synchronous>, transform_indices = @transform_3, window_bounds = array<i64: 1, 32>}, {pipeline_mode = #tpu.pipeline_mode<synchronous>, transform_indices = @transform_4, window_bounds = array<i64: 1, 32>}, {pipeline_mode = #tpu.pipeline_mode<synchronous>, transform_indices = @transform_5, window_bounds = array<i64: 2, 32, 128>}, {pipeline_mode = #tpu.pipeline_mode<synchronous>, transform_indices = @transform_6, window_bounds = array<i64: 2, 1, 128>}, {pipeline_mode = #tpu.pipeline_mode<synchronous>, transform_indices = @transform_7, window_bounds = array<i64: 2, 32, 32>}, {pipeline_mode = #tpu.pipeline_mode<synchronous>, transform_indices = @transform_8, window_bounds = array<i64: 2, 1, 32>}, {pipeline_mode = #tpu.pipeline_mode<synchronous>, transform_indices = @transform_9, window_bounds = array<i64: 2, 1, 32>}, {pipeline_mode = #tpu.pipeline_mode<synchronous>, transform_indices = @transform_10, window_bounds = array<i64: 2, 1, 32>}, {pipeline_mode = #tpu.pipeline_mode<synchronous>, transform_indices = @transform_11, window_bounds = array<i64: 2, 32, 64>}, {pipeline_mode = #tpu.pipeline_mode<synchronous>, transform_indices = @transform_12, window_bounds = array<i64: 2, 1, 64>}, {pipeline_mode = #tpu.pipeline_mode<synchronous>, transform_indices = @transform_13, window_bounds = array<i64: 2, 64, 32>}, {pipeline_mode = #tpu.pipeline_mode<synchronous>, transform_indices = @transform_14, window_bounds = array<i64: 2, 1, 32>}, {pipeline_mode = #tpu.pipeline_mode<synchronous>, transform_indices = @transform_15, window_bounds = array<i64: 2, 1, 32>}, {pipeline_mode = #tpu.pipeline_mode<synchronous>, transform_indices = @transform_16, window_bounds = array<i64: 2, 1, 32>}, {pipeline_mode = #tpu.pipeline_mode<synchronous>, transform_indices = @transform_17, window_bounds = array<i64: 32, 32>}, {pipeline_mode = #tpu.pipeline_mode<synchronous>, transform_indices = @transform_18, window_bounds = array<i64: 1, 32>}, {pipeline_mode = #tpu.pipeline_mode<synchronous>, transform_indices = @transform_19, window_bounds = array<i64: 32, 4>}, {pipeline_mode = #tpu.pipeline_mode<synchronous>, transform_indices = @transform_20, window_bounds = array<i64: 1, 4>}, {transform_indices = @transform_21, window_bounds = array<i64: 1, 1, 4>}, {transform_indices = @transform_22, window_bounds = array<i64: 1, 1, 1>}]} {
    %c0 = arith.constant 0 : index
    %c0_0 = arith.constant 0 : index
    %c0_1 = arith.constant 0 : index
    %0 = vector.load %arg1[%c0, %c0_0, %c0_1] : memref<1x8x32xf32, #tpu.memory_space<vmem>>, vector<1x8x32xf32>
    %1 = vector.shape_cast %0 : vector<1x8x32xf32> to vector<8x32xf32>
    %c0_2 = arith.constant 0 : index
    %c0_3 = arith.constant 0 : index
    %2 = vector.load %arg4[%c0_2, %c0_3] : memref<1x32xf32, #tpu.memory_space<vmem>>, vector<1x32xf32>
    %c0_4 = arith.constant 0 : index
    %c0_5 = arith.constant 0 : index
    %3 = vector.load %arg5[%c0_4, %c0_5] : memref<1x32xf32, #tpu.memory_space<vmem>>, vector<1x32xf32>
    %cst = arith.constant dense<0.000000e+00> : vector<8xf32>
    %4 = vector.multi_reduction <add>, %1, %cst [1] : vector<8x32xf32> to vector<8xf32>
    %5 = vector.shape_cast %4 : vector<8xf32> to vector<8x1xf32>
    %cst_6 = arith.constant 3.200000e+01 : f32
    %6 = vector.broadcast %cst_6 : f32 to vector<8x1xf32>
    %7 = arith.divf %5, %6 : vector<8x1xf32>
    %8 = vector.broadcast %7 : vector<8x1xf32> to vector<8x32xf32>
    %9 = arith.subf %1, %8 : vector<8x32xf32>
    %10 = vector.broadcast %7 : vector<8x1xf32> to vector<8x32xf32>
    %11 = arith.subf %1, %10 : vector<8x32xf32>
    %12 = arith.mulf %9, %11 : vector<8x32xf32>
    %cst_7 = arith.constant dense<0.000000e+00> : vector<8xf32>
    %13 = vector.multi_reduction <add>, %12, %cst_7 [1] : vector<8x32xf32> to vector<8xf32>
    %14 = vector.shape_cast %13 : vector<8xf32> to vector<8x1xf32>
    %cst_8 = arith.constant 3.200000e+01 : f32
    %15 = vector.broadcast %cst_8 : f32 to vector<8x1xf32>
    %16 = arith.divf %14, %15 : vector<8x1xf32>
    %17 = vector.broadcast %7 : vector<8x1xf32> to vector<8x32xf32>
    %18 = arith.subf %1, %17 : vector<8x32xf32>
    %cst_9 = arith.constant 9.99999996E-13 : f32
    %19 = vector.broadcast %cst_9 : f32 to vector<8x1xf32>
    %20 = arith.addf %16, %19 : vector<8x1xf32>
    %21 = math.rsqrt %20 : vector<8x1xf32>
    %22 = vector.broadcast %21 : vector<8x1xf32> to vector<8x32xf32>
    %23 = arith.mulf %18, %22 : vector<8x32xf32>
    %24 = vector.broadcast %2 : vector<1x32xf32> to vector<8x32xf32>
    %25 = arith.mulf %23, %24 : vector<8x32xf32>
    %26 = vector.broadcast %3 : vector<1x32xf32> to vector<8x32xf32>
    %27 = arith.addf %25, %26 : vector<8x32xf32>
    %c0_10 = arith.constant 0 : index
    %c0_11 = arith.constant 0 : index
    %c0_12 = arith.constant 0 : index
    %28 = vector.load %arg2[%c0_10, %c0_11, %c0_12] : memref<1x1x8xf32, #tpu.memory_space<vmem>>, vector<1x1x8xf32>
    %29 = vector.shape_cast %28 : vector<1x1x8xf32> to vector<1x8xf32>
    %c0_13 = arith.constant 0 : index
    %c0_14 = arith.constant 0 : index
    %c0_15 = arith.constant 0 : index
    %30 = vector.load %arg6[%c0_13, %c0_14, %c0_15] : memref<2x32x128xbf16, #tpu.memory_space<vmem>>, vector<1x32x128xbf16>
    %31 = vector.shape_cast %30 : vector<1x32x128xbf16> to vector<32x128xbf16>
    %32 = arith.truncf %27 : vector<8x32xf32> to vector<8x32xbf16>
    %cst_16 = arith.constant dense<0.000000e+00> : vector<8x128xf32>
    %33 = tpu.matmul %32, %31, %cst_16 {dimension_numbers = #tpu.dot_dimension_numbers<[1], [0], [0], [1], [0, 0, 1, 1], [], []>} : vector<8x32xbf16>, vector<32x128xbf16>, vector<8x128xf32> -> vector<8x128xf32>
    %c0_17 = arith.constant 0 : index
    %c0_18 = arith.constant 0 : index
    %c0_19 = arith.constant 0 : index
    %34 = vector.load %arg7[%c0_17, %c0_18, %c0_19] : memref<2x1x128xf32, #tpu.memory_space<vmem>>, vector<1x1x128xf32>
    %35 = vector.shape_cast %34 : vector<1x1x128xf32> to vector<1x128xf32>
    %36 = vector.broadcast %35 : vector<1x128xf32> to vector<8x128xf32>
    %37 = arith.addf %33, %36 : vector<8x128xf32>
    %38 = vector.extract_strided_slice %37 {offsets = [0, 0], sizes = [8, 16], strides = [1, 1]} : vector<8x128xf32> to vector<8x16xf32>
    %39 = vector.extract_strided_slice %37 {offsets = [0, 32], sizes = [8, 16], strides = [1, 1]} : vector<8x128xf32> to vector<8x16xf32>
    %40 = vector.extract_strided_slice %37 {offsets = [0, 64], sizes = [8, 16], strides = [1, 1]} : vector<8x128xf32> to vector<8x16xf32>
    %41 = arith.truncf %38 : vector<8x16xf32> to vector<8x16xbf16>
    %42 = arith.truncf %39 : vector<8x16xf32> to vector<8x16xbf16>
    %cst_20 = arith.constant dense<0.000000e+00> : vector<8x8xf32>
    %43 = tpu.matmul %41, %42, %cst_20 {dimension_numbers = #tpu.dot_dimension_numbers<[1], [1], [0], [0], [0, 0, 1, 0], [], []>} : vector<8x16xbf16>, vector<8x16xbf16>, vector<8x8xf32> -> vector<8x8xf32>
    %44 = vector.broadcast %29 : vector<1x8xf32> to vector<8x8xf32>
    %45 = arith.addf %43, %44 : vector<8x8xf32>
    %cst_21 = arith.constant dense<0xFF800000> : vector<8xf32>
    %46 = vector.multi_reduction <maximumf>, %45, %cst_21 [1] : vector<8x8xf32> to vector<8xf32>
    %47 = vector.shape_cast %46 : vector<8xf32> to vector<8x1xf32>
    %48 = vector.broadcast %47 : vector<8x1xf32> to vector<8x8xf32>
    %49 = arith.subf %45, %48 : vector<8x8xf32>
    %50 = math.exp %49 : vector<8x8xf32>
    %cst_22 = arith.constant dense<0.000000e+00> : vector<8xf32>
    %51 = vector.multi_reduction <add>, %50, %cst_22 [1] : vector<8x8xf32> to vector<8xf32>
    %52 = vector.shape_cast %51 : vector<8xf32> to vector<8x1xf32>
    %53 = tpu.reciprocal %52 {approx = true} : vector<8x1xf32> -> vector<8x1xf32>
    %54 = vector.broadcast %53 : vector<8x1xf32> to vector<8x8xf32>
    %55 = arith.mulf %50, %54 : vector<8x8xf32>
    %56 = arith.truncf %55 : vector<8x8xf32> to vector<8x8xbf16>
    %57 = arith.truncf %40 : vector<8x16xf32> to vector<8x16xbf16>
    %cst_23 = arith.constant dense<0.000000e+00> : vector<8x16xf32>
    %58 = tpu.matmul %56, %57, %cst_23 {dimension_numbers = #tpu.dot_dimension_numbers<[1], [0], [0], [1], [0, 0, 1, 1], [], []>} : vector<8x8xbf16>, vector<8x16xbf16>, vector<8x16xf32> -> vector<8x16xf32>
    %59 = vector.extract_strided_slice %37 {offsets = [0, 16], sizes = [8, 16], strides = [1, 1]} : vector<8x128xf32> to vector<8x16xf32>
    %60 = vector.extract_strided_slice %37 {offsets = [0, 48], sizes = [8, 16], strides = [1, 1]} : vector<8x128xf32> to vector<8x16xf32>
    %61 = vector.extract_strided_slice %37 {offsets = [0, 80], sizes = [8, 16], strides = [1, 1]} : vector<8x128xf32> to vector<8x16xf32>
    %62 = arith.truncf %59 : vector<8x16xf32> to vector<8x16xbf16>
    %63 = arith.truncf %60 : vector<8x16xf32> to vector<8x16xbf16>
    %cst_24 = arith.constant dense<0.000000e+00> : vector<8x8xf32>
    %64 = tpu.matmul %62, %63, %cst_24 {dimension_numbers = #tpu.dot_dimension_numbers<[1], [1], [0], [0], [0, 0, 1, 0], [], []>} : vector<8x16xbf16>, vector<8x16xbf16>, vector<8x8xf32> -> vector<8x8xf32>
    %65 = vector.broadcast %29 : vector<1x8xf32> to vector<8x8xf32>
    %66 = arith.addf %64, %65 : vector<8x8xf32>
    %cst_25 = arith.constant dense<0xFF800000> : vector<8xf32>
    %67 = vector.multi_reduction <maximumf>, %66, %cst_25 [1] : vector<8x8xf32> to vector<8xf32>
    %68 = vector.shape_cast %67 : vector<8xf32> to vector<8x1xf32>
    %69 = vector.broadcast %68 : vector<8x1xf32> to vector<8x8xf32>
    %70 = arith.subf %66, %69 : vector<8x8xf32>
    %71 = math.exp %70 : vector<8x8xf32>
    %cst_26 = arith.constant dense<0.000000e+00> : vector<8xf32>
    %72 = vector.multi_reduction <add>, %71, %cst_26 [1] : vector<8x8xf32> to vector<8xf32>
    %73 = vector.shape_cast %72 : vector<8xf32> to vector<8x1xf32>
    %74 = tpu.reciprocal %73 {approx = true} : vector<8x1xf32> -> vector<8x1xf32>
    %75 = vector.broadcast %74 : vector<8x1xf32> to vector<8x8xf32>
    %76 = arith.mulf %71, %75 : vector<8x8xf32>
    %77 = arith.truncf %76 : vector<8x8xf32> to vector<8x8xbf16>
    %78 = arith.truncf %61 : vector<8x16xf32> to vector<8x16xbf16>
    %cst_27 = arith.constant dense<0.000000e+00> : vector<8x16xf32>
    %79 = tpu.matmul %77, %78, %cst_27 {dimension_numbers = #tpu.dot_dimension_numbers<[1], [0], [0], [1], [0, 0, 1, 1], [], []>} : vector<8x8xbf16>, vector<8x16xbf16>, vector<8x16xf32> -> vector<8x16xf32>
    %80 = tpu.concatenate %58, %79 in 1 : vector<8x16xf32>, vector<8x16xf32> -> vector<8x32xf32>
    %c0_28 = arith.constant 0 : index
    %c0_29 = arith.constant 0 : index
    %c0_30 = arith.constant 0 : index
    %81 = vector.load %arg8[%c0_28, %c0_29, %c0_30] : memref<2x32x32xbf16, #tpu.memory_space<vmem>>, vector<1x32x32xbf16>
    %82 = vector.shape_cast %81 : vector<1x32x32xbf16> to vector<32x32xbf16>
    %83 = arith.truncf %80 : vector<8x32xf32> to vector<8x32xbf16>
    %cst_31 = arith.constant dense<0.000000e+00> : vector<8x32xf32>
    %84 = tpu.matmul %83, %82, %cst_31 {dimension_numbers = #tpu.dot_dimension_numbers<[1], [0], [0], [1], [0, 0, 1, 1], [], []>} : vector<8x32xbf16>, vector<32x32xbf16>, vector<8x32xf32> -> vector<8x32xf32>
    %c0_32 = arith.constant 0 : index
    %c0_33 = arith.constant 0 : index
    %c0_34 = arith.constant 0 : index
    %85 = vector.load %arg9[%c0_32, %c0_33, %c0_34] : memref<2x1x32xf32, #tpu.memory_space<vmem>>, vector<1x1x32xf32>
    %86 = vector.shape_cast %85 : vector<1x1x32xf32> to vector<1x32xf32>
    %87 = vector.broadcast %86 : vector<1x32xf32> to vector<8x32xf32>
    %88 = arith.addf %84, %87 : vector<8x32xf32>
    %89 = arith.addf %88, %27 : vector<8x32xf32>
    %c0_35 = arith.constant 0 : index
    %c0_36 = arith.constant 0 : index
    %c0_37 = arith.constant 0 : index
    %90 = vector.load %arg10[%c0_35, %c0_36, %c0_37] : memref<2x1x32xf32, #tpu.memory_space<vmem>>, vector<1x1x32xf32>
    %91 = vector.shape_cast %90 : vector<1x1x32xf32> to vector<1x32xf32>
    %c0_38 = arith.constant 0 : index
    %c0_39 = arith.constant 0 : index
    %c0_40 = arith.constant 0 : index
    %92 = vector.load %arg11[%c0_38, %c0_39, %c0_40] : memref<2x1x32xf32, #tpu.memory_space<vmem>>, vector<1x1x32xf32>
    %93 = vector.shape_cast %92 : vector<1x1x32xf32> to vector<1x32xf32>
    %cst_41 = arith.constant dense<0.000000e+00> : vector<8xf32>
    %94 = vector.multi_reduction <add>, %89, %cst_41 [1] : vector<8x32xf32> to vector<8xf32>
    %95 = vector.shape_cast %94 : vector<8xf32> to vector<8x1xf32>
    %cst_42 = arith.constant 3.200000e+01 : f32
    %96 = vector.broadcast %cst_42 : f32 to vector<8x1xf32>
    %97 = arith.divf %95, %96 : vector<8x1xf32>
    %98 = vector.broadcast %97 : vector<8x1xf32> to vector<8x32xf32>
    %99 = arith.subf %89, %98 : vector<8x32xf32>
    %100 = vector.broadcast %97 : vector<8x1xf32> to vector<8x32xf32>
    %101 = arith.subf %89, %100 : vector<8x32xf32>
    %102 = arith.mulf %99, %101 : vector<8x32xf32>
    %cst_43 = arith.constant dense<0.000000e+00> : vector<8xf32>
    %103 = vector.multi_reduction <add>, %102, %cst_43 [1] : vector<8x32xf32> to vector<8xf32>
    %104 = vector.shape_cast %103 : vector<8xf32> to vector<8x1xf32>
    %cst_44 = arith.constant 3.200000e+01 : f32
    %105 = vector.broadcast %cst_44 : f32 to vector<8x1xf32>
    %106 = arith.divf %104, %105 : vector<8x1xf32>
    %107 = vector.broadcast %97 : vector<8x1xf32> to vector<8x32xf32>
    %108 = arith.subf %89, %107 : vector<8x32xf32>
    %cst_45 = arith.constant 9.99999996E-13 : f32
    %109 = vector.broadcast %cst_45 : f32 to vector<8x1xf32>
    %110 = arith.addf %106, %109 : vector<8x1xf32>
    %111 = math.rsqrt %110 : vector<8x1xf32>
    %112 = vector.broadcast %111 : vector<8x1xf32> to vector<8x32xf32>
    %113 = arith.mulf %108, %112 : vector<8x32xf32>
    %114 = vector.broadcast %91 : vector<1x32xf32> to vector<8x32xf32>
    %115 = arith.mulf %113, %114 : vector<8x32xf32>
    %116 = vector.broadcast %93 : vector<1x32xf32> to vector<8x32xf32>
    %117 = arith.addf %115, %116 : vector<8x32xf32>
    %c0_46 = arith.constant 0 : index
    %c0_47 = arith.constant 0 : index
    %c0_48 = arith.constant 0 : index
    %118 = vector.load %arg12[%c0_46, %c0_47, %c0_48] : memref<2x32x64xbf16, #tpu.memory_space<vmem>>, vector<1x32x64xbf16>
    %119 = vector.shape_cast %118 : vector<1x32x64xbf16> to vector<32x64xbf16>
    %120 = arith.truncf %117 : vector<8x32xf32> to vector<8x32xbf16>
    %cst_49 = arith.constant dense<0.000000e+00> : vector<8x64xf32>
    %121 = tpu.matmul %120, %119, %cst_49 {dimension_numbers = #tpu.dot_dimension_numbers<[1], [0], [0], [1], [0, 0, 1, 1], [], []>} : vector<8x32xbf16>, vector<32x64xbf16>, vector<8x64xf32> -> vector<8x64xf32>
    %c0_50 = arith.constant 0 : index
    %c0_51 = arith.constant 0 : index
    %c0_52 = arith.constant 0 : index
    %122 = vector.load %arg13[%c0_50, %c0_51, %c0_52] : memref<2x1x64xf32, #tpu.memory_space<vmem>>, vector<1x1x64xf32>
    %123 = vector.shape_cast %122 : vector<1x1x64xf32> to vector<1x64xf32>
    %124 = vector.broadcast %123 : vector<1x64xf32> to vector<8x64xf32>
    %125 = arith.addf %121, %124 : vector<8x64xf32>
    %cst_53 = arith.constant 5.000000e-01 : f32
    %126 = vector.broadcast %cst_53 : f32 to vector<8x64xf32>
    %127 = arith.mulf %126, %125 : vector<8x64xf32>
    %cst_54 = arith.constant 4.471500e-02 : f32
    %128 = vector.broadcast %cst_54 : f32 to vector<8x64xf32>
    %129 = arith.mulf %128, %125 : vector<8x64xf32>
    %130 = arith.mulf %129, %125 : vector<8x64xf32>
    %131 = arith.mulf %130, %125 : vector<8x64xf32>
    %132 = arith.addf %125, %131 : vector<8x64xf32>
    %cst_55 = arith.constant 0.797884583 : f32
    %133 = vector.broadcast %cst_55 : f32 to vector<8x64xf32>
    %134 = arith.mulf %133, %132 : vector<8x64xf32>
    %135 = math.tanh %134 : vector<8x64xf32>
    %cst_56 = arith.constant 1.000000e+00 : f32
    %136 = vector.broadcast %cst_56 : f32 to vector<8x64xf32>
    %137 = arith.addf %136, %135 : vector<8x64xf32>
    %138 = arith.mulf %127, %137 : vector<8x64xf32>
    %c0_57 = arith.constant 0 : index
    %c0_58 = arith.constant 0 : index
    %c0_59 = arith.constant 0 : index
    %139 = vector.load %arg14[%c0_57, %c0_58, %c0_59] : memref<2x64x32xbf16, #tpu.memory_space<vmem>>, vector<1x64x32xbf16>
    %140 = vector.shape_cast %139 : vector<1x64x32xbf16> to vector<64x32xbf16>
    %141 = arith.truncf %138 : vector<8x64xf32> to vector<8x64xbf16>
    %cst_60 = arith.constant dense<0.000000e+00> : vector<8x32xf32>
    %142 = tpu.matmul %141, %140, %cst_60 {dimension_numbers = #tpu.dot_dimension_numbers<[1], [0], [0], [1], [0, 0, 1, 1], [], []>} : vector<8x64xbf16>, vector<64x32xbf16>, vector<8x32xf32> -> vector<8x32xf32>
    %c0_61 = arith.constant 0 : index
    %c0_62 = arith.constant 0 : index
    %c0_63 = arith.constant 0 : index
    %143 = vector.load %arg15[%c0_61, %c0_62, %c0_63] : memref<2x1x32xf32, #tpu.memory_space<vmem>>, vector<1x1x32xf32>
    %144 = vector.shape_cast %143 : vector<1x1x32xf32> to vector<1x32xf32>
    %145 = vector.broadcast %144 : vector<1x32xf32> to vector<8x32xf32>
    %146 = arith.addf %142, %145 : vector<8x32xf32>
    %147 = arith.addf %146, %117 : vector<8x32xf32>
    %c0_64 = arith.constant 0 : index
    %c0_65 = arith.constant 0 : index
    %c0_66 = arith.constant 0 : index
    %148 = vector.load %arg16[%c0_64, %c0_65, %c0_66] : memref<2x1x32xf32, #tpu.memory_space<vmem>>, vector<1x1x32xf32>
    %149 = vector.shape_cast %148 : vector<1x1x32xf32> to vector<1x32xf32>
    %c0_67 = arith.constant 0 : index
    %c0_68 = arith.constant 0 : index
    %c0_69 = arith.constant 0 : index
    %150 = vector.load %arg17[%c0_67, %c0_68, %c0_69] : memref<2x1x32xf32, #tpu.memory_space<vmem>>, vector<1x1x32xf32>
    %151 = vector.shape_cast %150 : vector<1x1x32xf32> to vector<1x32xf32>
    %cst_70 = arith.constant dense<0.000000e+00> : vector<8xf32>
    %152 = vector.multi_reduction <add>, %147, %cst_70 [1] : vector<8x32xf32> to vector<8xf32>
    %153 = vector.shape_cast %152 : vector<8xf32> to vector<8x1xf32>
    %cst_71 = arith.constant 3.200000e+01 : f32
    %154 = vector.broadcast %cst_71 : f32 to vector<8x1xf32>
    %155 = arith.divf %153, %154 : vector<8x1xf32>
    %156 = vector.broadcast %155 : vector<8x1xf32> to vector<8x32xf32>
    %157 = arith.subf %147, %156 : vector<8x32xf32>
    %158 = vector.broadcast %155 : vector<8x1xf32> to vector<8x32xf32>
    %159 = arith.subf %147, %158 : vector<8x32xf32>
    %160 = arith.mulf %157, %159 : vector<8x32xf32>
    %cst_72 = arith.constant dense<0.000000e+00> : vector<8xf32>
    %161 = vector.multi_reduction <add>, %160, %cst_72 [1] : vector<8x32xf32> to vector<8xf32>
    %162 = vector.shape_cast %161 : vector<8xf32> to vector<8x1xf32>
    %cst_73 = arith.constant 3.200000e+01 : f32
    %163 = vector.broadcast %cst_73 : f32 to vector<8x1xf32>
    %164 = arith.divf %162, %163 : vector<8x1xf32>
    %165 = vector.broadcast %155 : vector<8x1xf32> to vector<8x32xf32>
    %166 = arith.subf %147, %165 : vector<8x32xf32>
    %cst_74 = arith.constant 9.99999996E-13 : f32
    %167 = vector.broadcast %cst_74 : f32 to vector<8x1xf32>
    %168 = arith.addf %164, %167 : vector<8x1xf32>
    %169 = math.rsqrt %168 : vector<8x1xf32>
    %170 = vector.broadcast %169 : vector<8x1xf32> to vector<8x32xf32>
    %171 = arith.mulf %166, %170 : vector<8x32xf32>
    %172 = vector.broadcast %149 : vector<1x32xf32> to vector<8x32xf32>
    %173 = arith.mulf %171, %172 : vector<8x32xf32>
    %174 = vector.broadcast %151 : vector<1x32xf32> to vector<8x32xf32>
    %175 = arith.addf %173, %174 : vector<8x32xf32>
    %c1 = arith.constant 1 : index
    %c0_75 = arith.constant 0 : index
    %c0_76 = arith.constant 0 : index
    %176 = vector.load %arg6[%c1, %c0_75, %c0_76] : memref<2x32x128xbf16, #tpu.memory_space<vmem>>, vector<1x32x128xbf16>
    %177 = vector.shape_cast %176 : vector<1x32x128xbf16> to vector<32x128xbf16>
    %178 = arith.truncf %175 : vector<8x32xf32> to vector<8x32xbf16>
    %cst_77 = arith.constant dense<0.000000e+00> : vector<8x128xf32>
    %179 = tpu.matmul %178, %177, %cst_77 {dimension_numbers = #tpu.dot_dimension_numbers<[1], [0], [0], [1], [0, 0, 1, 1], [], []>} : vector<8x32xbf16>, vector<32x128xbf16>, vector<8x128xf32> -> vector<8x128xf32>
    %c1_78 = arith.constant 1 : index
    %c0_79 = arith.constant 0 : index
    %c0_80 = arith.constant 0 : index
    %180 = vector.load %arg7[%c1_78, %c0_79, %c0_80] : memref<2x1x128xf32, #tpu.memory_space<vmem>>, vector<1x1x128xf32>
    %181 = vector.shape_cast %180 : vector<1x1x128xf32> to vector<1x128xf32>
    %182 = vector.broadcast %181 : vector<1x128xf32> to vector<8x128xf32>
    %183 = arith.addf %179, %182 : vector<8x128xf32>
    %184 = vector.extract_strided_slice %183 {offsets = [0, 0], sizes = [8, 16], strides = [1, 1]} : vector<8x128xf32> to vector<8x16xf32>
    %185 = vector.extract_strided_slice %183 {offsets = [0, 32], sizes = [8, 16], strides = [1, 1]} : vector<8x128xf32> to vector<8x16xf32>
    %186 = vector.extract_strided_slice %183 {offsets = [0, 64], sizes = [8, 16], strides = [1, 1]} : vector<8x128xf32> to vector<8x16xf32>
    %187 = arith.truncf %184 : vector<8x16xf32> to vector<8x16xbf16>
    %188 = arith.truncf %185 : vector<8x16xf32> to vector<8x16xbf16>
    %cst_81 = arith.constant dense<0.000000e+00> : vector<8x8xf32>
    %189 = tpu.matmul %187, %188, %cst_81 {dimension_numbers = #tpu.dot_dimension_numbers<[1], [1], [0], [0], [0, 0, 1, 0], [], []>} : vector<8x16xbf16>, vector<8x16xbf16>, vector<8x8xf32> -> vector<8x8xf32>
    %190 = vector.broadcast %29 : vector<1x8xf32> to vector<8x8xf32>
    %191 = arith.addf %189, %190 : vector<8x8xf32>
    %cst_82 = arith.constant dense<0xFF800000> : vector<8xf32>
    %192 = vector.multi_reduction <maximumf>, %191, %cst_82 [1] : vector<8x8xf32> to vector<8xf32>
    %193 = vector.shape_cast %192 : vector<8xf32> to vector<8x1xf32>
    %194 = vector.broadcast %193 : vector<8x1xf32> to vector<8x8xf32>
    %195 = arith.subf %191, %194 : vector<8x8xf32>
    %196 = math.exp %195 : vector<8x8xf32>
    %cst_83 = arith.constant dense<0.000000e+00> : vector<8xf32>
    %197 = vector.multi_reduction <add>, %196, %cst_83 [1] : vector<8x8xf32> to vector<8xf32>
    %198 = vector.shape_cast %197 : vector<8xf32> to vector<8x1xf32>
    %199 = tpu.reciprocal %198 {approx = true} : vector<8x1xf32> -> vector<8x1xf32>
    %200 = vector.broadcast %199 : vector<8x1xf32> to vector<8x8xf32>
    %201 = arith.mulf %196, %200 : vector<8x8xf32>
    %202 = arith.truncf %201 : vector<8x8xf32> to vector<8x8xbf16>
    %203 = arith.truncf %186 : vector<8x16xf32> to vector<8x16xbf16>
    %cst_84 = arith.constant dense<0.000000e+00> : vector<8x16xf32>
    %204 = tpu.matmul %202, %203, %cst_84 {dimension_numbers = #tpu.dot_dimension_numbers<[1], [0], [0], [1], [0, 0, 1, 1], [], []>} : vector<8x8xbf16>, vector<8x16xbf16>, vector<8x16xf32> -> vector<8x16xf32>
    %205 = vector.extract_strided_slice %183 {offsets = [0, 16], sizes = [8, 16], strides = [1, 1]} : vector<8x128xf32> to vector<8x16xf32>
    %206 = vector.extract_strided_slice %183 {offsets = [0, 48], sizes = [8, 16], strides = [1, 1]} : vector<8x128xf32> to vector<8x16xf32>
    %207 = vector.extract_strided_slice %183 {offsets = [0, 80], sizes = [8, 16], strides = [1, 1]} : vector<8x128xf32> to vector<8x16xf32>
    %208 = arith.truncf %205 : vector<8x16xf32> to vector<8x16xbf16>
    %209 = arith.truncf %206 : vector<8x16xf32> to vector<8x16xbf16>
    %cst_85 = arith.constant dense<0.000000e+00> : vector<8x8xf32>
    %210 = tpu.matmul %208, %209, %cst_85 {dimension_numbers = #tpu.dot_dimension_numbers<[1], [1], [0], [0], [0, 0, 1, 0], [], []>} : vector<8x16xbf16>, vector<8x16xbf16>, vector<8x8xf32> -> vector<8x8xf32>
    %211 = vector.broadcast %29 : vector<1x8xf32> to vector<8x8xf32>
    %212 = arith.addf %210, %211 : vector<8x8xf32>
    %cst_86 = arith.constant dense<0xFF800000> : vector<8xf32>
    %213 = vector.multi_reduction <maximumf>, %212, %cst_86 [1] : vector<8x8xf32> to vector<8xf32>
    %214 = vector.shape_cast %213 : vector<8xf32> to vector<8x1xf32>
    %215 = vector.broadcast %214 : vector<8x1xf32> to vector<8x8xf32>
    %216 = arith.subf %212, %215 : vector<8x8xf32>
    %217 = math.exp %216 : vector<8x8xf32>
    %cst_87 = arith.constant dense<0.000000e+00> : vector<8xf32>
    %218 = vector.multi_reduction <add>, %217, %cst_87 [1] : vector<8x8xf32> to vector<8xf32>
    %219 = vector.shape_cast %218 : vector<8xf32> to vector<8x1xf32>
    %220 = tpu.reciprocal %219 {approx = true} : vector<8x1xf32> -> vector<8x1xf32>
    %221 = vector.broadcast %220 : vector<8x1xf32> to vector<8x8xf32>
    %222 = arith.mulf %217, %221 : vector<8x8xf32>
    %223 = arith.truncf %222 : vector<8x8xf32> to vector<8x8xbf16>
    %224 = arith.truncf %207 : vector<8x16xf32> to vector<8x16xbf16>
    %cst_88 = arith.constant dense<0.000000e+00> : vector<8x16xf32>
    %225 = tpu.matmul %223, %224, %cst_88 {dimension_numbers = #tpu.dot_dimension_numbers<[1], [0], [0], [1], [0, 0, 1, 1], [], []>} : vector<8x8xbf16>, vector<8x16xbf16>, vector<8x16xf32> -> vector<8x16xf32>
    %226 = tpu.concatenate %204, %225 in 1 : vector<8x16xf32>, vector<8x16xf32> -> vector<8x32xf32>
    %c1_89 = arith.constant 1 : index
    %c0_90 = arith.constant 0 : index
    %c0_91 = arith.constant 0 : index
    %227 = vector.load %arg8[%c1_89, %c0_90, %c0_91] : memref<2x32x32xbf16, #tpu.memory_space<vmem>>, vector<1x32x32xbf16>
    %228 = vector.shape_cast %227 : vector<1x32x32xbf16> to vector<32x32xbf16>
    %229 = arith.truncf %226 : vector<8x32xf32> to vector<8x32xbf16>
    %cst_92 = arith.constant dense<0.000000e+00> : vector<8x32xf32>
    %230 = tpu.matmul %229, %228, %cst_92 {dimension_numbers = #tpu.dot_dimension_numbers<[1], [0], [0], [1], [0, 0, 1, 1], [], []>} : vector<8x32xbf16>, vector<32x32xbf16>, vector<8x32xf32> -> vector<8x32xf32>
    %c1_93 = arith.constant 1 : index
    %c0_94 = arith.constant 0 : index
    %c0_95 = arith.constant 0 : index
    %231 = vector.load %arg9[%c1_93, %c0_94, %c0_95] : memref<2x1x32xf32, #tpu.memory_space<vmem>>, vector<1x1x32xf32>
    %232 = vector.shape_cast %231 : vector<1x1x32xf32> to vector<1x32xf32>
    %233 = vector.broadcast %232 : vector<1x32xf32> to vector<8x32xf32>
    %234 = arith.addf %230, %233 : vector<8x32xf32>
    %235 = arith.addf %234, %175 : vector<8x32xf32>
    %c1_96 = arith.constant 1 : index
    %c0_97 = arith.constant 0 : index
    %c0_98 = arith.constant 0 : index
    %236 = vector.load %arg10[%c1_96, %c0_97, %c0_98] : memref<2x1x32xf32, #tpu.memory_space<vmem>>, vector<1x1x32xf32>
    %237 = vector.shape_cast %236 : vector<1x1x32xf32> to vector<1x32xf32>
    %c1_99 = arith.constant 1 : index
    %c0_100 = arith.constant 0 : index
    %c0_101 = arith.constant 0 : index
    %238 = vector.load %arg11[%c1_99, %c0_100, %c0_101] : memref<2x1x32xf32, #tpu.memory_space<vmem>>, vector<1x1x32xf32>
    %239 = vector.shape_cast %238 : vector<1x1x32xf32> to vector<1x32xf32>
    %cst_102 = arith.constant dense<0.000000e+00> : vector<8xf32>
    %240 = vector.multi_reduction <add>, %235, %cst_102 [1] : vector<8x32xf32> to vector<8xf32>
    %241 = vector.shape_cast %240 : vector<8xf32> to vector<8x1xf32>
    %cst_103 = arith.constant 3.200000e+01 : f32
    %242 = vector.broadcast %cst_103 : f32 to vector<8x1xf32>
    %243 = arith.divf %241, %242 : vector<8x1xf32>
    %244 = vector.broadcast %243 : vector<8x1xf32> to vector<8x32xf32>
    %245 = arith.subf %235, %244 : vector<8x32xf32>
    %246 = vector.broadcast %243 : vector<8x1xf32> to vector<8x32xf32>
    %247 = arith.subf %235, %246 : vector<8x32xf32>
    %248 = arith.mulf %245, %247 : vector<8x32xf32>
    %cst_104 = arith.constant dense<0.000000e+00> : vector<8xf32>
    %249 = vector.multi_reduction <add>, %248, %cst_104 [1] : vector<8x32xf32> to vector<8xf32>
    %250 = vector.shape_cast %249 : vector<8xf32> to vector<8x1xf32>
    %cst_105 = arith.constant 3.200000e+01 : f32
    %251 = vector.broadcast %cst_105 : f32 to vector<8x1xf32>
    %252 = arith.divf %250, %251 : vector<8x1xf32>
    %253 = vector.broadcast %243 : vector<8x1xf32> to vector<8x32xf32>
    %254 = arith.subf %235, %253 : vector<8x32xf32>
    %cst_106 = arith.constant 9.99999996E-13 : f32
    %255 = vector.broadcast %cst_106 : f32 to vector<8x1xf32>
    %256 = arith.addf %252, %255 : vector<8x1xf32>
    %257 = math.rsqrt %256 : vector<8x1xf32>
    %258 = vector.broadcast %257 : vector<8x1xf32> to vector<8x32xf32>
    %259 = arith.mulf %254, %258 : vector<8x32xf32>
    %260 = vector.broadcast %237 : vector<1x32xf32> to vector<8x32xf32>
    %261 = arith.mulf %259, %260 : vector<8x32xf32>
    %262 = vector.broadcast %239 : vector<1x32xf32> to vector<8x32xf32>
    %263 = arith.addf %261, %262 : vector<8x32xf32>
    %c1_107 = arith.constant 1 : index
    %c0_108 = arith.constant 0 : index
    %c0_109 = arith.constant 0 : index
    %264 = vector.load %arg12[%c1_107, %c0_108, %c0_109] : memref<2x32x64xbf16, #tpu.memory_space<vmem>>, vector<1x32x64xbf16>
    %265 = vector.shape_cast %264 : vector<1x32x64xbf16> to vector<32x64xbf16>
    %266 = arith.truncf %263 : vector<8x32xf32> to vector<8x32xbf16>
    %cst_110 = arith.constant dense<0.000000e+00> : vector<8x64xf32>
    %267 = tpu.matmul %266, %265, %cst_110 {dimension_numbers = #tpu.dot_dimension_numbers<[1], [0], [0], [1], [0, 0, 1, 1], [], []>} : vector<8x32xbf16>, vector<32x64xbf16>, vector<8x64xf32> -> vector<8x64xf32>
    %c1_111 = arith.constant 1 : index
    %c0_112 = arith.constant 0 : index
    %c0_113 = arith.constant 0 : index
    %268 = vector.load %arg13[%c1_111, %c0_112, %c0_113] : memref<2x1x64xf32, #tpu.memory_space<vmem>>, vector<1x1x64xf32>
    %269 = vector.shape_cast %268 : vector<1x1x64xf32> to vector<1x64xf32>
    %270 = vector.broadcast %269 : vector<1x64xf32> to vector<8x64xf32>
    %271 = arith.addf %267, %270 : vector<8x64xf32>
    %cst_114 = arith.constant 5.000000e-01 : f32
    %272 = vector.broadcast %cst_114 : f32 to vector<8x64xf32>
    %273 = arith.mulf %272, %271 : vector<8x64xf32>
    %cst_115 = arith.constant 4.471500e-02 : f32
    %274 = vector.broadcast %cst_115 : f32 to vector<8x64xf32>
    %275 = arith.mulf %274, %271 : vector<8x64xf32>
    %276 = arith.mulf %275, %271 : vector<8x64xf32>
    %277 = arith.mulf %276, %271 : vector<8x64xf32>
    %278 = arith.addf %271, %277 : vector<8x64xf32>
    %cst_116 = arith.constant 0.797884583 : f32
    %279 = vector.broadcast %cst_116 : f32 to vector<8x64xf32>
    %280 = arith.mulf %279, %278 : vector<8x64xf32>
    %281 = math.tanh %280 : vector<8x64xf32>
    %cst_117 = arith.constant 1.000000e+00 : f32
    %282 = vector.broadcast %cst_117 : f32 to vector<8x64xf32>
    %283 = arith.addf %282, %281 : vector<8x64xf32>
    %284 = arith.mulf %273, %283 : vector<8x64xf32>
    %c1_118 = arith.constant 1 : index
    %c0_119 = arith.constant 0 : index
    %c0_120 = arith.constant 0 : index
    %285 = vector.load %arg14[%c1_118, %c0_119, %c0_120] : memref<2x64x32xbf16, #tpu.memory_space<vmem>>, vector<1x64x32xbf16>
    %286 = vector.shape_cast %285 : vector<1x64x32xbf16> to vector<64x32xbf16>
    %287 = arith.truncf %284 : vector<8x64xf32> to vector<8x64xbf16>
    %cst_121 = arith.constant dense<0.000000e+00> : vector<8x32xf32>
    %288 = tpu.matmul %287, %286, %cst_121 {dimension_numbers = #tpu.dot_dimension_numbers<[1], [0], [0], [1], [0, 0, 1, 1], [], []>} : vector<8x64xbf16>, vector<64x32xbf16>, vector<8x32xf32> -> vector<8x32xf32>
    %c1_122 = arith.constant 1 : index
    %c0_123 = arith.constant 0 : index
    %c0_124 = arith.constant 0 : index
    %289 = vector.load %arg15[%c1_122, %c0_123, %c0_124] : memref<2x1x32xf32, #tpu.memory_space<vmem>>, vector<1x1x32xf32>
    %290 = vector.shape_cast %289 : vector<1x1x32xf32> to vector<1x32xf32>
    %291 = vector.broadcast %290 : vector<1x32xf32> to vector<8x32xf32>
    %292 = arith.addf %288, %291 : vector<8x32xf32>
    %293 = arith.addf %292, %263 : vector<8x32xf32>
    %c1_125 = arith.constant 1 : index
    %c0_126 = arith.constant 0 : index
    %c0_127 = arith.constant 0 : index
    %294 = vector.load %arg16[%c1_125, %c0_126, %c0_127] : memref<2x1x32xf32, #tpu.memory_space<vmem>>, vector<1x1x32xf32>
    %295 = vector.shape_cast %294 : vector<1x1x32xf32> to vector<1x32xf32>
    %c1_128 = arith.constant 1 : index
    %c0_129 = arith.constant 0 : index
    %c0_130 = arith.constant 0 : index
    %296 = vector.load %arg17[%c1_128, %c0_129, %c0_130] : memref<2x1x32xf32, #tpu.memory_space<vmem>>, vector<1x1x32xf32>
    %297 = vector.shape_cast %296 : vector<1x1x32xf32> to vector<1x32xf32>
    %cst_131 = arith.constant dense<0.000000e+00> : vector<8xf32>
    %298 = vector.multi_reduction <add>, %293, %cst_131 [1] : vector<8x32xf32> to vector<8xf32>
    %299 = vector.shape_cast %298 : vector<8xf32> to vector<8x1xf32>
    %cst_132 = arith.constant 3.200000e+01 : f32
    %300 = vector.broadcast %cst_132 : f32 to vector<8x1xf32>
    %301 = arith.divf %299, %300 : vector<8x1xf32>
    %302 = vector.broadcast %301 : vector<8x1xf32> to vector<8x32xf32>
    %303 = arith.subf %293, %302 : vector<8x32xf32>
    %304 = vector.broadcast %301 : vector<8x1xf32> to vector<8x32xf32>
    %305 = arith.subf %293, %304 : vector<8x32xf32>
    %306 = arith.mulf %303, %305 : vector<8x32xf32>
    %cst_133 = arith.constant dense<0.000000e+00> : vector<8xf32>
    %307 = vector.multi_reduction <add>, %306, %cst_133 [1] : vector<8x32xf32> to vector<8xf32>
    %308 = vector.shape_cast %307 : vector<8xf32> to vector<8x1xf32>
    %cst_134 = arith.constant 3.200000e+01 : f32
    %309 = vector.broadcast %cst_134 : f32 to vector<8x1xf32>
    %310 = arith.divf %308, %309 : vector<8x1xf32>
    %311 = vector.broadcast %301 : vector<8x1xf32> to vector<8x32xf32>
    %312 = arith.subf %293, %311 : vector<8x32xf32>
    %cst_135 = arith.constant 9.99999996E-13 : f32
    %313 = vector.broadcast %cst_135 : f32 to vector<8x1xf32>
    %314 = arith.addf %310, %313 : vector<8x1xf32>
    %315 = math.rsqrt %314 : vector<8x1xf32>
    %316 = vector.broadcast %315 : vector<8x1xf32> to vector<8x32xf32>
    %317 = arith.mulf %312, %316 : vector<8x32xf32>
    %318 = vector.broadcast %295 : vector<1x32xf32> to vector<8x32xf32>
    %319 = arith.mulf %317, %318 : vector<8x32xf32>
    %320 = vector.broadcast %297 : vector<1x32xf32> to vector<8x32xf32>
    %321 = arith.addf %319, %320 : vector<8x32xf32>
    %322 = vector.extract_strided_slice %321 {offsets = [0, 0], sizes = [1, 32], strides = [1, 1]} : vector<8x32xf32> to vector<1x32xf32>
    %c0_136 = arith.constant 0 : index
    %c0_137 = arith.constant 0 : index
    %323 = vector.load %arg18[%c0_136, %c0_137] : memref<32x32xbf16, #tpu.memory_space<vmem>>, vector<32x32xbf16>
    %324 = arith.truncf %322 : vector<1x32xf32> to vector<1x32xbf16>
    %cst_138 = arith.constant dense<0.000000e+00> : vector<1x32xf32>
    %325 = tpu.matmul %324, %323, %cst_138 {dimension_numbers = #tpu.dot_dimension_numbers<[1], [0], [0], [1], [0, 0, 1, 1], [], []>} : vector<1x32xbf16>, vector<32x32xbf16>, vector<1x32xf32> -> vector<1x32xf32>
    %c0_139 = arith.constant 0 : index
    %c0_140 = arith.constant 0 : index
    %326 = vector.load %arg19[%c0_139, %c0_140] : memref<1x32xf32, #tpu.memory_space<vmem>>, vector<1x32xf32>
    %327 = arith.addf %325, %326 : vector<1x32xf32>
    %328 = math.tanh %327 : vector<1x32xf32>
    %c0_141 = arith.constant 0 : index
    %c0_142 = arith.constant 0 : index
    %329 = vector.load %arg20[%c0_141, %c0_142] : memref<32x4xbf16, #tpu.memory_space<vmem>>, vector<32x4xbf16>
    %330 = arith.truncf %328 : vector<1x32xf32> to vector<1x32xbf16>
    %cst_143 = arith.constant dense<0.000000e+00> : vector<1x4xf32>
    %331 = tpu.matmul %330, %329, %cst_143 {dimension_numbers = #tpu.dot_dimension_numbers<[1], [0], [0], [1], [0, 0, 1, 1], [], []>} : vector<1x32xbf16>, vector<32x4xbf16>, vector<1x4xf32> -> vector<1x4xf32>
    %c0_144 = arith.constant 0 : index
    %c0_145 = arith.constant 0 : index
    %332 = vector.load %arg21[%c0_144, %c0_145] : memref<1x4xf32, #tpu.memory_space<vmem>>, vector<1x4xf32>
    %333 = arith.addf %331, %332 : vector<1x4xf32>
    %c0_146 = arith.constant 0 : index
    %c0_147 = arith.constant 0 : index
    %c0_148 = arith.constant 0 : index
    %334 = vector.load %arg22[%c0_146, %c0_147, %c0_148] : memref<1x1x4xf32, #tpu.memory_space<vmem>>, vector<1x1x4xf32>
    %335 = vector.shape_cast %334 : vector<1x1x4xf32> to vector<1x4xf32>
    %336 = vector.shape_cast %333 : vector<1x4xf32> to vector<1x1x4xf32>
    tpu.vector_store %arg22[%c0_146, %c0_147, %c0_148], %336 {strides = array<i32>} : memref<1x1x4xf32, #tpu.memory_space<vmem>>, vector<1x1x4xf32>,
    %c0_149 = arith.constant 0 : index
    %c0_150 = arith.constant 0 : index
    %c0_151 = arith.constant 0 : index
    %337 = vector.load %arg3[%c0_149, %c0_150, %c0_151] : memref<1x1x4xf32, #tpu.memory_space<vmem>>, vector<1x1x4xf32>
    %338 = vector.shape_cast %337 : vector<1x1x4xf32> to vector<1x4xf32>
    %cst_152 = arith.constant 0.000000e+00 : f32
    %339 = vector.broadcast %cst_152 : f32 to vector<1x4xf32>
    %340 = arith.maximumf %333, %339 : vector<1x4xf32>
    %341 = arith.mulf %333, %338 : vector<1x4xf32>
    %342 = arith.subf %340, %341 : vector<1x4xf32>
    %343 = math.absf %333 : vector<1x4xf32>
    %cst_153 = arith.constant 0.000000e+00 : f32
    %344 = vector.broadcast %cst_153 : f32 to vector<1x4xf32>
    %345 = arith.subf %344, %343 : vector<1x4xf32>
    %346 = math.exp %345 : vector<1x4xf32>
    %cst_154 = arith.constant 1.000000e+00 : f32
    %347 = vector.broadcast %cst_154 : f32 to vector<1x4xf32>
    %348 = arith.addf %347, %346 : vector<1x4xf32>
    %349 = math.log %348 : vector<1x4xf32>
    %350 = arith.addf %342, %349 : vector<1x4xf32>
    %cst_155 = arith.constant dense<0.000000e+00> : vector<1xf32>
    %351 = vector.multi_reduction <add>, %350, %cst_155 [1] : vector<1x4xf32> to vector<1xf32>
    %352 = vector.shape_cast %351 : vector<1xf32> to vector<1x1xf32>
    %c0_156 = arith.constant 0 : index
    %c0_157 = arith.constant 0 : index
    %c0_158 = arith.constant 0 : index
    %353 = vector.load %arg23[%c0_156, %c0_157, %c0_158] : memref<1x1x1xf32, #tpu.memory_space<vmem>>, vector<1x1x1xf32>
    %354 = vector.shape_cast %353 : vector<1x1x1xf32> to vector<1x1xf32>
    %355 = vector.shape_cast %352 : vector<1x1xf32> to vector<1x1x1xf32>
    tpu.vector_store %arg23[%c0_156, %c0_157, %c0_158], %355 {strides = array<i32>} : memref<1x1x1xf32, #tpu.memory_space<vmem>>, vector<1x1x1xf32>,
    return
  }
  func.func @transform_0(%arg0: i32) -> (i32, i32, i32) {
    %c0_i32 = arith.constant 0 : i32
    %c0_i32_0 = arith.constant 0 : i32
    %c0_i32_1 = arith.constant 0 : i32
    return %arg0, %c0_i32, %c0_i32_0 : i32, i32, i32
  }
  func.func @transform_1(%arg0: i32) -> (i32, i32, i32) {
    %c0_i32 = arith.constant 0 : i32
    %c0_i32_0 = arith.constant 0 : i32
    %c0_i32_1 = arith.constant 0 : i32
    return %arg0, %c0_i32, %c0_i32_0 : i32, i32, i32
  }
  func.func @transform_2(%arg0: i32) -> (i32, i32, i32) {
    %c0_i32 = arith.constant 0 : i32
    %c0_i32_0 = arith.constant 0 : i32
    %c0_i32_1 = arith.constant 0 : i32
    return %arg0, %c0_i32, %c0_i32_0 : i32, i32, i32
  }
  func.func @transform_3(%arg0: i32) -> (i32, i32) {
    %c0_i32 = arith.constant 0 : i32
    %c0_i32_0 = arith.constant 0 : i32
    %c0_i32_1 = arith.constant 0 : i32
    return %c0_i32, %c0_i32_0 : i32, i32
  }
  func.func @transform_4(%arg0: i32) -> (i32, i32) {
    %c0_i32 = arith.constant 0 : i32
    %c0_i32_0 = arith.constant 0 : i32
    %c0_i32_1 = arith.constant 0 : i32
    return %c0_i32, %c0_i32_0 : i32, i32
  }
  func.func @transform_5(%arg0: i32) -> (i32, i32, i32) {
    %c0_i32 = arith.constant 0 : i32
    %c0_i32_0 = arith.constant 0 : i32
    %c0_i32_1 = arith.constant 0 : i32
    %c0_i32_2 = arith.constant 0 : i32
    return %c0_i32, %c0_i32_0, %c0_i32_1 : i32, i32, i32
  }
  func.func @transform_6(%arg0: i32) -> (i32, i32, i32) {
    %c0_i32 = arith.constant 0 : i32
    %c0_i32_0 = arith.constant 0 : i32
    %c0_i32_1 = arith.constant 0 : i32
    %c0_i32_2 = arith.constant 0 : i32
    return %c0_i32, %c0_i32_0, %c0_i32_1 : i32, i32, i32
  }
  func.func @transform_7(%arg0: i32) -> (i32, i32, i32) {
    %c0_i32 = arith.constant 0 : i32
    %c0_i32_0 = arith.constant 0 : i32
    %c0_i32_1 = arith.constant 0 : i32
    %c0_i32_2 = arith.constant 0 : i32
    return %c0_i32, %c0_i32_0, %c0_i32_1 : i32, i32, i32
  }
  func.func @transform_8(%arg0: i32) -> (i32, i32, i32) {
    %c0_i32 = arith.constant 0 : i32
    %c0_i32_0 = arith.constant 0 : i32
    %c0_i32_1 = arith.constant 0 : i32
    %c0_i32_2 = arith.constant 0 : i32
    return %c0_i32, %c0_i32_0, %c0_i32_1 : i32, i32, i32
  }
  func.func @transform_9(%arg0: i32) -> (i32, i32, i32) {
    %c0_i32 = arith.constant 0 : i32
    %c0_i32_0 = arith.constant 0 : i32
    %c0_i32_1 = arith.constant 0 : i32
    %c0_i32_2 = arith.constant 0 : i32
    return %c0_i32, %c0_i32_0, %c0_i32_1 : i32, i32, i32
  }
  func.func @transform_10(%arg0: i32) -> (i32, i32, i32) {
    %c0_i32 = arith.constant 0 : i32
    %c0_i32_0 = arith.constant 0 : i32
    %c0_i32_1 = arith.constant 0 : i32
    %c0_i32_2 = arith.constant 0 : i32
    return %c0_i32, %c0_i32_0, %c0_i32_1 : i32, i32, i32
  }
  func.func @transform_11(%arg0: i32) -> (i32, i32, i32) {
    %c0_i32 = arith.constant 0 : i32
    %c0_i32_0 = arith.constant 0 : i32
    %c0_i32_1 = arith.constant 0 : i32
    %c0_i32_2 = arith.constant 0 : i32
    return %c0_i32, %c0_i32_0, %c0_i32_1 : i32, i32, i32
  }
  func.func @transform_12(%arg0: i32) -> (i32, i32, i32) {
    %c0_i32 = arith.constant 0 : i32
    %c0_i32_0 = arith.constant 0 : i32
    %c0_i32_1 = arith.constant 0 : i32
    %c0_i32_2 = arith.constant 0 : i32
    return %c0_i32, %c0_i32_0, %c0_i32_1 : i32, i32, i32
  }
  func.func @transform_13(%arg0: i32) -> (i32, i32, i32) {
    %c0_i32 = arith.constant 0 : i32
    %c0_i32_0 = arith.constant 0 : i32
    %c0_i32_1 = arith.constant 0 : i32
    %c0_i32_2 = arith.constant 0 : i32
    return %c0_i32, %c0_i32_0, %c0_i32_1 : i32, i32, i32
  }
  func.func @transform_14(%arg0: i32) -> (i32, i32, i32) {
    %c0_i32 = arith.constant 0 : i32
    %c0_i32_0 = arith.constant 0 : i32
    %c0_i32_1 = arith.constant 0 : i32
    %c0_i32_2 = arith.constant 0 : i32
    return %c0_i32, %c0_i32_0, %c0_i32_1 : i32, i32, i32
  }
  func.func @transform_15(%arg0: i32) -> (i32, i32, i32) {
    %c0_i32 = arith.constant 0 : i32
    %c0_i32_0 = arith.constant 0 : i32
    %c0_i32_1 = arith.constant 0 : i32
    %c0_i32_2 = arith.constant 0 : i32
    return %c0_i32, %c0_i32_0, %c0_i32_1 : i32, i32, i32
  }
  func.func @transform_16(%arg0: i32) -> (i32, i32, i32) {
    %c0_i32 = arith.constant 0 : i32
    %c0_i32_0 = arith.constant 0 : i32
    %c0_i32_1 = arith.constant 0 : i32
    %c0_i32_2 = arith.constant 0 : i32
    return %c0_i32, %c0_i32_0, %c0_i32_1 : i32, i32, i32
  }
  func.func @transform_17(%arg0: i32) -> (i32, i32) {
    %c0_i32 = arith.constant 0 : i32
    %c0_i32_0 = arith.constant 0 : i32
    %c0_i32_1 = arith.constant 0 : i32
    return %c0_i32, %c0_i32_0 : i32, i32
  }
  func.func @transform_18(%arg0: i32) -> (i32, i32) {
    %c0_i32 = arith.constant 0 : i32
    %c0_i32_0 = arith.constant 0 : i32
    %c0_i32_1 = arith.constant 0 : i32
    return %c0_i32, %c0_i32_0 : i32, i32
  }
  func.func @transform_19(%arg0: i32) -> (i32, i32) {
    %c0_i32 = arith.constant 0 : i32
    %c0_i32_0 = arith.constant 0 : i32
    %c0_i32_1 = arith.constant 0 : i32
    return %c0_i32, %c0_i32_0 : i32, i32
  }
  func.func @transform_20(%arg0: i32) -> (i32, i32) {
    %c0_i32 = arith.constant 0 : i32
    %c0_i32_0 = arith.constant 0 : i32
    %c0_i32_1 = arith.constant 0 : i32
    return %c0_i32, %c0_i32_0 : i32, i32
  }
  func.func @transform_21(%arg0: i32) -> (i32, i32, i32) {
    %c0_i32 = arith.constant 0 : i32
    %c0_i32_0 = arith.constant 0 : i32
    %c0_i32_1 = arith.constant 0 : i32
    return %arg0, %c0_i32, %c0_i32_0 : i32, i32, i32
  }
  func.func @transform_22(%arg0: i32) -> (i32, i32, i32) {
    %c0_i32 = arith.constant 0 : i32
    %c0_i32_0 = arith.constant 0 : i32
    %c0_i32_1 = arith.constant 0 : i32
    return %arg0, %c0_i32, %c0_i32_0 : i32, i32, i32
  }
}

</mosaic_0001>

<bundles_post_ra>
// kernel: tpu_custom_call.1
= control target key start
LH: loop header
LB: loop body
LE: loop exit
PB: predicated region body
PF: predicated region fallthrough
CT: control target
= control target key end

     0   :  { %s3940_s0 = inlined_call_operand.vmem [shape: f32[2,8,32], index: 0, kind: input, shape index: {}]   ;;  %s3941_s1 = inlined_call_operand.hbm [shape: f32[2,1,8], index: 1, kind: input, shape index: {}]   ;;  %s3942_s2 = inlined_call_operand.hbm [shape: f32[2,1,4], index: 2, kind: input, shape index: {}]   ;;  %s3943_s3 = inlined_call_operand.vmem [shape: f32[1,32], index: 3, kind: input, shape index: {}]   ;;  %s3944_s4 = inlined_call_operand.hbm [shape: f32[1,32], index: 4, kind: input, shape index: {}]   ;;  %s3945_s5 = inlined_call_operand.vmem [shape: bf16[2,32,128], index: 5, kind: input, shape index: {}]   ;;  %s3946_s6 = inlined_call_operand.hbm [shape: f32[2,1,128], index: 6, kind: input, shape index: {}]   ;;  %s3947_s7 = inlined_call_operand.vmem [shape: bf16[2,32,32], index: 7, kind: input, shape index: {}]   ;;  %s3948_s8 = inlined_call_operand.hbm [shape: f32[2,1,32], index: 8, kind: input, shape index: {}]   ;;  %s3949_s9 = inlined_call_operand.hbm [shape: f32[2,1,32], index: 9, kind: input, shape index: {}]   ;;  %s3950_s10 = inlined_call_operand.hbm [shape: f32[2,1,32], index: 10, kind: input, shape index: {}]   ;;  %s3951_s11 = inlined_call_operand.vmem [shape: bf16[2,32,64], index: 11, kind: input, shape index: {}]   ;;  %s3952_s12 = inlined_call_operand.hbm [shape: f32[2,1,64], index: 12, kind: input, shape index: {}]   ;;  %s3953_s13 = inlined_call_operand.vmem [shape: bf16[2,64,32], index: 13, kind: input, shape index: {}]   ;;  %s3954_s14 = inlined_call_operand.vmem [shape: f32[2,1,32], index: 14, kind: input, shape index: {}]   ;;  %s3955_s15 = inlined_call_operand.vmem [shape: f32[2,1,32], index: 15, kind: input, shape index: {}]   ;;  %s3956_s16 = inlined_call_operand.vmem [shape: f32[2,1,32], index: 16, kind: input, shape index: {}]   ;;  %s3957_s17 = inlined_call_operand.vmem [shape: bf16[32,32], index: 17, kind: input, shape index: {}]   ;;  %s3958_s18 = inlined_call_operand.vmem [shape: f32[1,32], index: 18, kind: input, shape index: {}]   ;;  %s3959_s19 = inlined_call_operand.vmem [shape: bf16[32,4], index: 19, kind: input, shape index: {}]   ;;  %s3960_s20 = inlined_call_operand.vmem [shape: f32[1,4], index: 20, kind: input, shape index: {}]   ;;  %s3961_s21 = inlined_call_operand.hbm [shape: f32[2,1,4], index: 21, kind: output, shape index: {0}]   ;;  %s3962_s22 = inlined_call_operand.vmem [shape: f32[2,1,1], index: 22, kind: output, shape index: {1}]  }
   0x1   :  { %3981 = sst [smem:[#allocation25_spill]] %s3940_s0 }
   0x2   :  { %3982 = sst [smem:[#allocation26_spill]] %s3941_s1 }
   0x3   :  { %3983 = sst [smem:[#allocation27_spill]] %s3942_s2 }
   0x4   :  { %3984 = sst [smem:[#allocation28_spill]] %s3943_s3 }
   0x5   :  { %3985 = sst [smem:[#allocation29_spill]] %s3944_s4 }
   0x6   :  { %3986 = sst [smem:[#allocation30_spill]] %s3945_s5 }
   0x7   :  { %3987 = sst [smem:[#allocation31_spill]] %s3946_s6 }
   0x8   :  { %3988 = sst [smem:[#allocation32_spill]] %s3948_s8 }
   0x9   :  { %3989 = sst [smem:[#allocation33_spill]] %s3949_s9 }
   0xa   :  { %3990 = sst [smem:[#allocation34_spill]] %s3950_s10 }
   0xb   :  { %3991 = sst [smem:[#allocation35_spill]] %s3952_s12 }
   0xc   :  { %3992 = sst [smem:[#allocation36_spill]] %s3955_s15 }
   0xd   :  { %3993 = sst [smem:[#allocation37_spill]] %s3956_s16 }
   0xe   :  { %3994 = sst [smem:[#allocation38_spill]] %s3957_s17 }
   0xf   :  { %3995 = sst [smem:[#allocation39_spill]] %s3958_s18 }
  0x10   :  { %3996 = sst [smem:[#allocation40_spill]] %s3959_s19 }
  0x11   :  { %3997 = sst [smem:[#allocation41_spill]] %s3960_s20 }
  0x12   :  { %3998 = sst [smem:[#allocation42_spill]] %s3961_s21 }
  0x13   :  { %3999 = sst [smem:[#allocation43_spill]] %s3962_s22 }
  0x14   :  { %28 = vsyncpa [#allocation3], 0 }
  0x15   :  { %30 = vsyncpa [#allocation3 + $0x1], 0 }
  0x16   :  { %31 = vsyncpa [#allocation6], 0 }
  0x17   :  { %33 = vsyncpa [#allocation6 + $0x1], 0 }
  0x18   :  { %34 = vsyncpa [#allocation9], 0 }
  0x19   :  { %35 = vsyncpa [#allocation12], 0 }
  0x1a   :  { %36 = vsyncpa [#allocation15], 0 }
  0x1b   :  { %37 = vsyncpa [#allocation4], 0 }
  0x1c   :  { %39 = vsyncpa [#allocation4 + $0x1], 0  ;;  %s3308_s3 = smov 0   ;;  %s3310_s28 = smov 0  }
  0x1d   :  { %s3312_s29 = smov 0   ;;  %s3314_s30 = smov 0  }
  0x1e LB: > { %s3174_s4 = smov [#allocation7]   ;;  %s3329_s23 = sadd.s32 4294967295, %s3172_s30   ;;  %s3172_s30 = sphi %s3314_s30, %s4046_s30   ;;  %s3168_s29 = sphi %s3312_s29, %s4045_s29   ;;  %s3164_s28 = sphi %s3310_s28, %s4044_s28   ;;  %s3160_s3 = sphi %s3308_s3, %s4043_s3  }
  0x1f   : > { %s574_s0 = sshll.u32 %s3174_s4, 4  ;;  %p2385_p0 = scmp.ge.s32.totalorder %s3172_s30, 1  ;;  %s3334_s0 = int_to_ptr.vmem [resolvable:$true] %s574_s0 }
  0x20   : > { %p3975_p1 = scmp.eq.s32.totalorder %s3329_s23, 0  ;;  %p558_p2 = scmp.lt.s32.totalorder %s3172_s30, 3 }
  0x21   : > { %s3175_s5 = smov [#allocation8]   ;;  %s3176_s25 = smov [#allocation11]  }
  0x22   : > { %p3336_p3 = pnand %p2385_p0, %p558_p2  ;;  %s587_s24 = sshll.u32 %s3175_s5, 4  ;;  %s3343_s24 = int_to_ptr.vmem [resolvable:$true] %s587_s24 }
  0x23   : > { %s616_s26 = sshll.u32 %s3176_s25, 4  ;;  %s4002_s4 = sld [smem:[#allocation29_spill]]  ;;  %s3351_s26 = int_to_ptr.vmem [resolvable:$true] %s616_s26 }
  0x24   : > { %s4000_s1 = scalar_select %p3336_p3, 1, 0 }
  0x25   : > { %p2706_p5 = pneg %p3336_p3 }
  0x27   : > { %p3347_p6 = pnand %p2706_p5, %p3975_p1 }
  0x29   : > { %s2858_s22 = scalar_lea.hbm %s4002_s4, 16  ;;  %p3361_p8 = pneg %p3347_p6 }
  0x2a   : > { %p2859_p7 = scmp.ne.s32.totalorder %s4002_s4, %s2858_s22  ;;  %p2865_p11 = scmp.lt.u32.totalorder %s2858_s22, %s4002_s4 }
  0x2c   : > { %p2861_p9 = pnand %p3361_p8, %p2859_p7 }
  0x2e   : > { %p2862_p10 = pneg %p2861_p9 }
  0x30   : > { %p2867_p12 = pnand %p2865_p11, %p2862_p10 }
  0x32   : > { %2870 = shalt.err (!%p2867_p12)
}
  0x33   : > { %s2871_s20 = scalar_lea.vmem %s3334_s0, 16  ;;  %s2878_s21 = scalar_lea.vmem %s3334_s0, 32 }
  0x34   : > { %p2872_p13 = scmp.ne.s32.totalorder %s3334_s0, %s2871_s20  ;;  %p2879_p5 = scmp.lt.s32.totalorder %s3334_s0, %s3334_s0 }
  0x35   : > { %p2880_p7 = scmp.lt.s32.totalorder %s2878_s21, %s2871_s20 }
  0x36   : > { %p2874_p0 = pnand %p2872_p13, %p3361_p8 }
  0x37   : > { %p2881_p9 = por %p2880_p7, %p2879_p5 }
  0x38   : > { %p2875_p2 = pneg %p2874_p0 }
  0x3a   : > { %p2882_p4 = pnand %p2881_p9, %p2875_p2 }
  0x3c   : > { %2885 = shalt.err (!%p2882_p4)
}
  0x3d   : > { %2709 = dma.hbm_to_vmem [thread:$0]  (!%p3347_p6), %s4002_s4, 16, %s3334_s0, [#allocation6]  }
  0x3e   : > { %s4004_s25 = sld [smem:[#allocation31_spill]] }
  0x44   : > { %s2886_s19 = scalar_lea.hbm %s4004_s25, 32 }
  0x45   : > { %p2887_p10 = scmp.ne.s32.totalorder %s4004_s25, %s2886_s19  ;;  %p2893_p4 = scmp.lt.u32.totalorder %s2886_s19, %s4004_s25 }
  0x47   : > { %p2889_p11 = pnand %p2887_p10, %p3361_p8 }
  0x49   : > { %p2890_p12 = pneg %p2889_p11 }
  0x4b   : > { %p2895_p13 = pnand %p2893_p4, %p2890_p12 }
  0x4d   : > { %2898 = shalt.err (!%p2895_p13)
}
  0x4e   : > { %s2899_s0 = scalar_lea.vmem %s3343_s24, 32  ;;  %p2907_p7 = scmp.lt.s32.totalorder %s3343_s24, %s3343_s24 }
  0x4f   : > { %p2900_p0 = scmp.ne.s32.totalorder %s3343_s24, %s2899_s0  ;;  %p2908_p9 = scmp.lt.s32.totalorder %s2899_s0, %s2899_s0 }
  0x51   : > { %p2902_p2 = pnand %p2900_p0, %p3361_p8  ;;  %p2909_p10 = por %p2908_p9, %p2907_p7 }
  0x53   : > { %p2903_p5 = pneg %p2902_p2 }
  0x55   : > { %p2910_p11 = pnand %p2909_p10, %p2903_p5 }
  0x57   : > { %2913 = shalt.err (!%p2910_p11)
}
  0x58   : > { %s3177_s16 = smov 16   ;;  %s3178_s17 = smov 1  }
  0x59   : > { %2712 = dma.hbm_to_vmem [thread:$0]  (!%p3347_p6), %s4004_s25, 32, %s3343_s24, [#allocation9], %s3177_s16, %s3177_s16, %s3178_s17  }
  0x5a   : > { %s4005_s9 = sld [smem:[#allocation33_spill]] }
  0x60   : > { %s2914_s27 = scalar_lea.hbm %s4005_s9, 32 }
  0x61   : > { %p2915_p12 = scmp.ne.s32.totalorder %s4005_s9, %s2914_s27  ;;  %p2921_p0 = scmp.lt.u32.totalorder %s2914_s27, %s4005_s9 }
  0x63   : > { %p2917_p4 = pnand %p2915_p12, %p3361_p8 }
  0x65   : > { %p2918_p13 = pneg %p2917_p4 }
  0x67   : > { %p2923_p2 = pnand %p2921_p0, %p2918_p13 }
  0x69   : > { %2926 = shalt.err (!%p2923_p2)
}
  0x6a   : > { %s2927_s24 = scalar_lea.vmem %s3351_s26, 32  ;;  %p2935_p10 = scmp.lt.s32.totalorder %s3351_s26, %s3351_s26 }
  0x6b   : > { %p2928_p5 = scmp.ne.s32.totalorder %s3351_s26, %s2927_s24  ;;  %p2936_p11 = scmp.lt.s32.totalorder %s2927_s24, %s2927_s24 }
  0x6d   : > { %p2930_p7 = pnand %p2928_p5, %p3361_p8  ;;  %p2937_p12 = por %p2936_p11, %p2935_p10 }
  0x6f   : > { %p2931_p9 = pneg %p2930_p7 }
  0x71   : > { %p2938_p4 = pnand %p2937_p12, %p2931_p9 }
  0x73   : > { %2941 = shalt.err (!%p2938_p4)
}
  0x74   : > { %2718 = dma.hbm_to_vmem [thread:$0]  (!%p3347_p6), %s4005_s9, 32, %s3351_s26, [#allocation12], %s3177_s16, %s3177_s16, %s3178_s17  }
  0x75   : > { %s3179_s18 = smov [#allocation10]   ;;  %s3180_s2 = smov [#allocation13]  }
  0x76   : > { %s603_s22 = sshll.u32 %s3179_s18, 4  ;;  %s629_s27 = sshll.u32 %s3180_s2, 4  ;;  %s604_s22 = int_to_ptr.vmem [resolvable:$true] %s603_s22  ;;  %s630_s27 = int_to_ptr.vmem [resolvable:$true] %s629_s27 }
  0x77   : > { %s4006_s8 = sld [smem:[#allocation32_spill]] }
  0x7d   : > { %s2942_s0 = scalar_lea.hbm %s4006_s8, 32 }
  0x7e   : > { %p2943_p13 = scmp.ne.s32.totalorder %s4006_s8, %s2942_s0  ;;  %p2949_p5 = scmp.lt.u32.totalorder %s2942_s0, %s4006_s8 }
  0x80   : > { %p2945_p0 = pnand %p2943_p13, %p3361_p8 }
  0x82   : > { %p2946_p2 = pneg %p2945_p0 }
  0x84   : > { %p2951_p7 = pnand %p2949_p5, %p2946_p2 }
  0x86   : > { %2954 = shalt.err (!%p2951_p7)
}
  0x87   : > { %s2955_s26 = scalar_lea.vmem %s604_s22, 32  ;;  %p2963_p12 = scmp.lt.s32.totalorder %s604_s22, %s604_s22 }
  0x88   : > { %p2956_p9 = scmp.ne.s32.totalorder %s604_s22, %s2955_s26  ;;  %p2964_p4 = scmp.lt.s32.totalorder %s2955_s26, %s2955_s26 }
  0x8a   : > { %p2958_p10 = pnand %p2956_p9, %p3361_p8  ;;  %p2965_p1 = por %p2964_p4, %p2963_p12 }
  0x8c   : > { %p2959_p11 = pneg %p2958_p10 }
  0x8e   : > { %p2966_p3 = pnand %p2965_p1, %p2959_p11 }
  0x90   : > { %2969 = shalt.err (!%p2966_p3)
}
  0x91   : > { %2715 = dma.hbm_to_vmem [thread:$0]  (!%p3347_p6), %s4006_s8, 32, %s604_s22, [#allocation9], %s3177_s16, %s3177_s16, %s3178_s17  }
  0x92   : > { %s4007_s10 = sld [smem:[#allocation34_spill]] }
  0x98   : > { %s2970_s2 = scalar_lea.hbm %s4007_s10, 32 }
  0x99   : > { %p2971_p1 = scmp.ne.s32.totalorder %s4007_s10, %s2970_s2  ;;  %p2977_p0 = scmp.lt.u32.totalorder %s2970_s2, %s4007_s10 }
  0x9b   : > { %p2973_p3 = pnand %p2971_p1, %p3361_p8 }
  0x9d   : > { %p2974_p13 = pneg %p2973_p3 }
  0x9f   : > { %p2979_p2 = pnand %p2977_p0, %p2974_p13 }
  0xa1   : > { %2982 = shalt.err (!%p2979_p2)
}
  0xa2   : > { %s2983_s4 = scalar_lea.vmem %s630_s27, 32  ;;  %p2991_p10 = scmp.lt.s32.totalorder %s630_s27, %s630_s27 }
  0xa3   : > { %p2984_p5 = scmp.ne.s32.totalorder %s630_s27, %s2983_s4  ;;  %p2992_p11 = scmp.lt.s32.totalorder %s2983_s4, %s2983_s4 }
  0xa5   : > { %p2986_p7 = pnand %p2984_p5, %p3361_p8  ;;  %p2993_p12 = por %p2992_p11, %p2991_p10 }
  0xa7   : > { %p2987_p9 = pneg %p2986_p7 }
  0xa9   : > { %p2994_p4 = pnand %p2993_p12, %p2987_p9 }
  0xab   : > { %2997 = shalt.err (!%p2994_p4)
}
  0xac   : > { %2721 = dma.hbm_to_vmem [thread:$0]  (!%p3347_p6), %s4007_s10, 32, %s630_s27, [#allocation12], %s3177_s16, %s3177_s16, %s3178_s17  }
  0xad   : > { %s3181_s15 = smov [#allocation14]   ;;  %s4008_s12 = sld [smem:[#allocation35_spill]] }
  0xae   : > { %s645_s25 = sshll.u32 %s3181_s15, 4  ;;  %s646_s25 = int_to_ptr.vmem [resolvable:$true] %s645_s25 }
  0xb3   : > { %s2998_s2 = scalar_lea.hbm %s4008_s12, 32 }
  0xb4   : > { %p2999_p1 = scmp.ne.s32.totalorder %s4008_s12, %s2998_s2  ;;  %p3005_p0 = scmp.lt.u32.totalorder %s2998_s2, %s4008_s12 }
  0xb6   : > { %p3001_p3 = pnand %p2999_p1, %p3361_p8 }
  0xb8   : > { %p3002_p13 = pneg %p3001_p3 }
  0xba   : > { %p3007_p2 = pnand %p3005_p0, %p3002_p13 }
  0xbc   : > { %3010 = shalt.err (!%p3007_p2)
}
  0xbd   : > { %s3011_s27 = scalar_lea.vmem %s646_s25, 32  ;;  %p3019_p10 = scmp.lt.s32.totalorder %s646_s25, %s646_s25 }
  0xbe   : > { %p3012_p5 = scmp.ne.s32.totalorder %s646_s25, %s3011_s27  ;;  %p3020_p11 = scmp.lt.s32.totalorder %s3011_s27, %s3011_s27 }
  0xc0   : > { %p3014_p7 = pnand %p3012_p5, %p3361_p8  ;;  %p3021_p12 = por %p3020_p11, %p3019_p10 }
  0xc2   : > { %p3015_p9 = pneg %p3014_p7 }
  0xc4   : > { %p3022_p4 = pnand %p3021_p12, %p3015_p9 }
  0xc6   : > { %3025 = shalt.err (!%p3022_p4)
}
  0xc7   : > { %2724 = dma.hbm_to_vmem [thread:$0]  (!%p3347_p6), %s4008_s12, 32, %s646_s25, [#allocation15], %s3177_s16, %s3177_s16, %s3178_s17  }
  0xc8   : > { %s2384_s6 = sadd.s32 4294967294, %s3172_s30   ;;  %s3500_s5 = sadd.s32 1, %s3172_s30  }
  0xc9   : > { %s75_s26 = ssub.s32 %s3172_s30, %s3500_s5  ;;  %s78_s15 = sadd.s32 1, %s3168_s29 }
  0xca   : > { %p76_p8 = scmp.eq.s32.totalorder %s75_s26, 0  ;;  %p85_p1 = scmp.ne.s32.totalorder %s3168_s29, %s3164_s28 }
  0xcb   : > { %p86_p3 = scmp.eq.s32.totalorder %s3172_s30, 0  ;;  %p91_p13 = scmp.ne.s32.totalorder %s3164_s28, %s3160_s3 }
  0xcc   : > { %s3511_s19 = scalar_select %p76_p8, %s3168_s29, %s78_s15  }
  0xcd   : > { %p3513_p0 = por %p86_p3, %p85_p1  ;;  %p4011_p2 = scmp.eq.s32.totalorder %s3329_s23, 0 }
  0xce   : > { %4009 = sst [smem:[#allocation24_spill]] %s3511_s19  ;;  %p519_p5 = scmp.eq.s32.totalorder %s3329_s23, 1 }
  0xcf   : > { %p3519_p6 = por %p4011_p2, %p91_p13  ;;  %p525_p7 = scmp.eq.s32.totalorder %s2384_s6, 1 }
  0xd0   : > { %p2742_p9 = scmp.lt.s32.totalorder %s3172_s30, 2  ;;  %s3526_s17 = sand.u32 1, %s3168_s29  }
  0xd1   : > { %s4012_s16 = scalar_select %p3519_p6, 1, 0 }
  0xd2   : > { %p3528_p10 = por %p519_p5, %p85_p1  ;;  %p3532_p11 = por %p525_p7, %p91_p13 }
  0xd3   : > { %s2393_s20 = sshll.u32 %s3172_s30, 4  ;;  %s693_s21 = scalar_lea.vmem [#allocation2], %s3526_s17 }
  0xd4   : > { %s4013_s25 = scalar_select %p3528_p10, 1, 0 }
  0xd5   : > { %s4014_s2 = scalar_select %p3532_p11, 1, 0 }
  0xd6   : > { %s700_s0 = sshll.u32 %s693_s21, 4  ;;  %s4015_s4 = sld [smem:[#allocation26_spill]]  ;;  %s3543_s0 = int_to_ptr.vmem [resolvable:$true] %s700_s0 }
  0xd7   : > { %p3547_p12 = pnand %p2742_p9, %p3513_p0  ;;  %s4017_s8 = sld [smem:[#allocation27_spill]] }
  0xd8   : > { %s707_s24 = sand.u32 1, %s3172_s30   ;;  %s691_s27 = scalar_lea.sflag [#allocation3], %s3526_s17 }
  0xd9   : > { %p3028_p8 = pneg %p3547_p12 }
  0xdc   : > { %s3541_s22 = scalar_lea.hbm %s4015_s4, %s2393_s20  ;;  %s3031_s12 = scalar_lea.hbm %s4015_s4, 32 }
  0xdd   : > { %s3554_s21 = scalar_lea.hbm %s4017_s8, %s2393_s20  ;;  %s3026_s9 = scalar_lea.hbm %s3541_s22, 16 }
  0xde   : > { %p3027_p4 = scmp.ne.s32.totalorder %s3541_s22, %s3026_s9  ;;  %p3032_p13 = scmp.lt.u32.totalorder %s3541_s22, %s4015_s4 }
  0xdf   : > { %p3033_p0 = scmp.lt.u32.totalorder %s3031_s12, %s3026_s9  ;;  %p3035_p5 = scmp.lt.u32.totalorder %s3026_s9, %s3541_s22 }
  0xe0   : > { %p3029_p1 = pnand %p3028_p8, %p3027_p4 }
  0xe1   : > { %p3034_p2 = por %p3033_p0, %p3032_p13 }
  0xe2   : > { %p3030_p3 = pneg %p3029_p1 }
  0xe3   : > { %p3036_p7 = por %p3035_p5, %p3034_p2 }
  0xe5   : > { %p3037_p9 = pnand %p3036_p7, %p3030_p3 }
  0xe7   : > { %3040 = shalt.err (!%p3037_p9)
}
  0xe8   : > { %s3041_s20 = scalar_lea.vmem %s3543_s0, 16  ;;  %s3182_s10 = smov [#allocation2]  }
  0xe9   : > { %p3042_p4 = scmp.ne.s32.totalorder %s3543_s0, %s3041_s20  ;;  %s3046_s15 = sshll.u32 %s3182_s10, 4  ;;  %s3047_s15 = int_to_ptr.vmem [resolvable:$false] %s3046_s15 }
  0xea   : > { %s3048_s19 = scalar_lea.vmem %s3047_s15, 32  ;;  %p3049_p10 = scmp.lt.s32.totalorder %s3543_s0, %s3047_s15 }
  0xeb   : > { %p3044_p1 = pnand %p3042_p4, %p3028_p8  ;;  %p3050_p13 = scmp.lt.s32.totalorder %s3048_s19, %s3041_s20 }
  0xed   : > { %p3045_p11 = pneg %p3044_p1  ;;  %p3051_p0 = por %p3050_p13, %p3049_p10 }
  0xef   : > { %p3052_p2 = pnand %p3051_p0, %p3045_p11 }
  0xf1   : > { %3055 = shalt.err (!%p3052_p2)
}
  0xf2   : > { %2728 = dma.hbm_to_vmem [thread:$0]  (!%p3547_p12), %s3541_s22, 16, %s3543_s0, %s691_s27  }
  0xf3   : > { %s710_s9 = scalar_lea.vmem [#allocation5], %s3526_s17  ;;  %s708_s18 = scalar_lea.sflag [#allocation6], %s707_s24 }
  0xf4   : > { %s717_s12 = sshll.u32 %s710_s9, 4  ;;  %s3056_s26 = scalar_lea.hbm %s3554_s21, 16  ;;  %s718_s12 = int_to_ptr.vmem [resolvable:$true] %s717_s12 }
  0xf5   : > { %p3057_p10 = scmp.ne.s32.totalorder %s3554_s21, %s3056_s26  ;;  %s3061_s15 = scalar_lea.hbm %s4017_s8, 32 }
  0xf6   : > { %p3062_p5 = scmp.lt.u32.totalorder %s3554_s21, %s4017_s8  ;;  %p3063_p7 = scmp.lt.u32.totalorder %s3061_s15, %s3056_s26 }
  0xf7   : > { %p3059_p11 = pnand %p3057_p10, %p3028_p8  ;;  %p3065_p4 = scmp.lt.u32.totalorder %s3056_s26, %s3554_s21 }
  0xf8   : > { %p3064_p9 = por %p3063_p7, %p3062_p5 }
  0xf9   : > { %p3060_p3 = pneg %p3059_p11 }
  0xfa   : > { %p3066_p1 = por %p3065_p4, %p3064_p9 }
  0xfc   : > { %p3067_p13 = pnand %p3066_p1, %p3060_p3 }
  0xfe   : > { %3070 = shalt.err (!%p3067_p13)
}
  0xff   : > { %s3071_s17 = scalar_lea.vmem %s718_s12, 16  ;;  %s3183_s0 = smov [#allocation5]  }
 0x100   : > { %p3072_p0 = scmp.ne.s32.totalorder %s718_s12, %s3071_s17  ;;  %s3076_s22 = sshll.u32 %s3183_s0, 4  ;;  %s3077_s22 = int_to_ptr.vmem [resolvable:$false] %s3076_s22 }
 0x101   : > { %s3078_s24 = scalar_lea.vmem %s3077_s22, 32  ;;  %p3079_p11 = scmp.lt.s32.totalorder %s718_s12, %s3077_s22 }
 0x102   : > { %p3074_p2 = pnand %p3072_p0, %p3028_p8  ;;  %p3080_p6 = scmp.lt.s32.totalorder %s3078_s24, %s3071_s17 }
 0x104   : > { %p3075_p10 = pneg %p3074_p2  ;;  %p3081_p5 = por %p3080_p6, %p3079_p11 }
 0x106   : > { %p3082_p7 = pnand %p3081_p5, %p3075_p10 }
 0x108   : > { %3085 = shalt.err (!%p3082_p7)
}
 0x109   : > { %2731 = dma.hbm_to_vmem [thread:$0]  (!%p3547_p12), %s3554_s21, 16, %s718_s12, %s708_s18  }
 0x10a   : > { %p4018_p3 = scmp.ne.s32.totalorder %s4000_s1, 0 }
 0x10b   : > { %s3608_s4 = sand.u32 (!%p4018_p3), 1, %s3164_s28   ;;  %p4019_p8 = scmp.ne.s32.totalorder (!%p4018_p3), %s4012_s16, 0 }
 0x10c   : > { %726 = sbr.rel (%p4018_p3) target bundleno = 6255 (0x186f), region = 104  ;;  %s729_s27 = scalar_lea.sflag (!%p4018_p3), [#allocation3], %s3608_s4 }
 0x10d   : > { %s731_s9 = scalar_lea.vmem (!%p4018_p3), [#allocation2], %s3608_s4 }
 0x113   : > { %3131 = dma.done.wait (%p4019_p8), %s729_s27, 16  }
 0x114   : > { %3133 = vsyncadd (%p4019_p8), %s729_s27, 4294967280  ;;  %s736_s6 = sand.u32 1, %s3329_s23   ;;  %s739_s1 = scalar_lea.vmem [#allocation5], %s3608_s4 }
 0x115   : > { %s737_s21 = scalar_lea.sflag [#allocation6], %s736_s6 }
 0x116   : > { %3135 = dma.done.wait (%p4019_p8), %s737_s21, 16  }
 0x117   : > { %3137 = vsyncadd (%p4019_p8), %s737_s21, 4294967280  ;;  %p4020_p6 = scmp.eq.s32.totalorder %s3329_s23, 0 }
 0x119   : > { %3139 = dma.done.wait (%p4020_p6), [#allocation6], 16   ;;  %p4021_p12 = pmov %p4020_p6 }
 0x11a   : > { %p4022_p9 = pmov %p4020_p6 }
 0x11b   : > { %3141 = vsyncadd (%p4021_p12), [#allocation6], 4294967280 }
 0x11c   : > { %3143 = dma.done.wait (%p4022_p9), [#allocation9], 64   ;;  %p4023_p4 = pmov %p4020_p6 }
 0x11e   : > { %3145 = vsyncadd (%p4023_p4), [#allocation9], 4294967232  ;;  %p4024_p1 = pmov %p4023_p4 }
 0x120   : > { %3147 = dma.done.wait (%p4024_p1), [#allocation12], 64   ;;  %p4025_p13 = pmov %p4024_p1 }
 0x121   : > { %p4026_p0 = pmov %p4024_p1 }
 0x122   : > { %3149 = vsyncadd (%p4025_p13), [#allocation12], 4294967232 }
 0x123   : > { %3151 = dma.done.wait (%p4026_p0), [#allocation15], 32   ;;  %p4027_p2 = pmov %p4026_p0 }
 0x124   : > { %p833_p10 = scmp.lt.s32.totalorder %s3329_s23, 1  ;;  %s4028_s20 = sld [smem:[#allocation25_spill]]  ;;  %vm844_vm0 = vcmask 261120   ;;  %v3184_v8 = vmov 0.0   ;;  %vm3185_vm1 = vmmov 0   ;;  %vm951_vm2 = vcmask 130048  }
 0x125   : > { %3153 = vsyncadd (%p4027_p2), [#allocation15], 4294967264  ;;  %s4029_s17 = sld [smem:[#allocation30_spill]]  ;;  %2540 = vmatprep.subr.bf16.mxu0 %v3184_v8  ;;  %2548 = vmatprep.subr.bf16.mxu1 %v3184_v8  ;;  %s4030_s6 = sld [smem:[#allocation28_spill]]  ;;  %v2404_v16 = vld [vmem:[#allocation7] ss:$0 sm:$0xff] }
 0x126   : > { %s3640_s16 = scalar_select %p833_p10, %s3329_s23, 1  ;;  %2544 = vmatprep.mubr.msk.bf16.mxu0 %vm3185_vm1, %v3184_v8  ;;  %2550 = vmatprep.mubr.msk.bf16.mxu1 %vm3185_vm1, %v3184_v8  ;;  %v2405_v20 = vld [vmem:[#allocation8] ss:$0 sm:$0xff]  ;;  %v3687_v32 = vld [vmem:[%s731_s9] ss:$0 sm:$0xff]  ;;  %vm998_vm3 = vcmask 64512  }
 0x127   : > { %s3186_s21 = smov 112   ;;  %s3188_s18 = smov 80   ;;  %vm1016_vm4 = vcmask 1043456   ;;  %vm1388_vm5 = vcmask 523264   ;;  %vm2175_vm6 = vcmask 24576  }
 0x128   : > { %s2402_s12 = sshll.u32 %s3640_s16, 3  ;;  %s3189_s9 = smov 48  }
 0x129   : > { %s3190_s26 = smov 64   ;;  %s3191_s0 = smov 16  }
 0x12a   : > { %s836_s10 = scalar_lea.vmem %s4028_s20, %s2402_s12  ;;  %s3187_s12 = smov 96  }
 0x12b   : > { %v841_v0 = vld [vmem:[%s836_s10] sm:$0xff]  ;;  %v2799_v9 = vld [vmem:[%s4029_s17 + $0x8] sm:$0xff]   ;;  %s4031_s20 = sld [smem:[#allocation36_spill]]  ;;  %s4032_s19 = sld [smem:[#allocation37_spill]] }
 0x12c   : > { %v845_v1 = vsel %vm844_vm0, %v841_v0, 0.0  ;;  %v2798_v7 = vld [vmem:[%s4029_s17] sm:$0xff]   ;;  %s4033_s27 = sld [smem:[#allocation38_spill]]  ;;  %s4035_s15 = sld [smem:[#allocation39_spill]] }
 0x12d   : > { %846 = vadd.xlane.f32.xlu0 %v845_v1  ;;  %2541 = vmatpush3.bf16.msra.mxu0 %v2798_v7  ;;  %v2403_v14 = vld [vmem:[%s4030_s6] ss:$0 sm:$0xff]  ;;  %s4037_s10 = sld [smem:[#allocation42_spill]]  ;;  %p4038_p5 = scmp.ne.s32.totalorder %s4013_s25, 0 }
 0x12e   : > { %2542 = vmatprep.subr.bf16.mxu0 %v3184_v8 }
 0x131   : > { %2543 = vmatpush3.bf16.msra.mxu0 %v2799_v9 }
 0x132   : > { %2554 = vmatprep.subr.bf16.mxu0 %v3184_v8 }
 0x1ba   : > { %v847_v2 = vpop.xlane.xlu0 %846 }
 0x1bb   : > { %v849_v3 = vmul.f32 0.03125, %v847_v2 }
 0x1bd   : > { %v850_v4 = vsub.f32 %v841_v0, %v849_v3  ;;  %v2800_v3 = vld [vmem:[%s3947_s7] sm:$0xff]  }
 0x1bf   : > { %v851_v5 = vmul.f32 %v850_v4, %v850_v4 }
 0x1c1   : > { %v852_v6 = vsel %vm844_vm0, %v851_v5, 0.0 }
 0x1c2   : > { %853 = vadd.xlane.f32.xlu0 %v852_v6 }
 0x24f   : > { %v854_v10 = vpop.xlane.xlu0 %853 }
 0x250   : > { %v855_v11 = vmul.f32 0.03125, %v854_v10 }
 0x252   : > { %v856_v12 = vadd.f32 1e-12, %v855_v11 }
 0x254   : > { %2822 = vrsqrt.f32 %v856_v12 }
 0x25e   : > { %v2823_v13 = vpop.eup %2822 }
 0x25f   : > { %v858_v15 = vmul.f32 %v2823_v13, %v850_v4  ;;  %v2801_v4 = vld [vmem:[%s3947_s7 + $0x8] sm:$0xff]  }
 0x261   : > { %v865_v17 = vmul.f32 %v2403_v14, %v858_v15 }
 0x263   : > { %v3665_v18 = vadd.f32 %v2404_v16, %v865_v17  ;;  %v2414_v17 = vld [vmem:[#allocation10] ss:$0 sm:$0xff] }
 0x265   : > { %v878_v19 = vpack.c.bf16 %v3665_v18, %v3665_v18 }
 0x267   : > { %2545 = vmatmul.mubr.msk.bf16.vlgmr.msra.gmra.mrb[0].mxu0 %vm844_vm0, %v878_v19 }
 0x268   : > { %2556 = vmatprep.mubr.msk.bf16.mxu0 %vm3185_vm1, %v3184_v8 }
 0x33a   : > { %v935_v21 = vpop.f32.mrb[0].mxu0 }
 0x33b   : > { %v936_v22 = vadd.f32 %v2405_v20, %v935_v21  ;;  %v2546_v23 = vpop.f32.mrb[1].mxu0 }
 0x33c   : > { %v938_v24 = vpop.f32.mrb[2].mxu0 }
 0x33d   : > { %v941_v25 = vpack.c.bf16 %v936_v22, %v936_v22  ;;  %v2547_v26 = vpop.f32.mrb[3].mxu0 }
 0x33f   : > { %1060 = vrot.lane.b32.xlu0 %v941_v25, %s3186_s21  ;;  %949 = vrot.lane.b32.xlu1 %v941_v25, %s3187_s12 }
 0x343   : > { %1062 = vrot.lane.b32.xlu1 %v941_v25, %s3188_s18 }
 0x3b1   : > { %v950_v27 = vpop.permute.xlu1 %949  ;;  %v1061_v31 = vpop.permute.xlu0 %1060 }
 0x3b2   : > { %v956_v28 = vsel %vm951_vm2, %v950_v27, 0 }
 0x3b3   : > { %2549 = vmatpush3.bf16.xpose.msra.mxu1 %v956_v28 }
 0x3b4   : > { %2560 = vmatprep.subr.bf16.mxu1 %v3184_v8 }
 0x3b5   : > { %v1063_v29 = vpop.permute.xlu1 %1062 }
 0x3b6   : > { %v1068_v30 = vsel %vm951_vm2, %v1063_v29, 0 }
 0x3ba   : > { %2551 = vmatmul.mubr.msk.bf16.vlgmr.msra.gmra.mrb[0].mxu1 %vm951_vm2, %v941_v25 }
 0x3bb   : > { %2561 = vmatpush3.bf16.xpose.msra.mxu1 %v1068_v30  ;;  %2562 = vmatprep.mubr.msk.bf16.mxu1 %vm3185_vm1, %v3184_v8 }
 0x3bc   : > { %2572 = vmatprep.subr.bf16.mxu1 %v3184_v8 }
 0x3c2   : > { %2563 = vmatmul.mubr.msk.bf16.vlgmr.msra.gmra.mrb[4].mxu1 %vm951_vm2, %v1061_v31  ;;  %v2802_v31 = vld [vmem:[%s3951_s11] sm:$0xff]  }
 0x3c3   : > { %2576 = vmatprep.mubr.msk.bf16.mxu1 %vm3185_vm1, %v3184_v8  ;;  %2573 = vmatpush3.bf16.msra.mxu1 %v2800_v3 }
 0x3c4   : > { %2574 = vmatprep.subr.bf16.mxu1 %v3184_v8 }
 0x3c7   : > { %2575 = vmatpush3.bf16.msra.mxu1 %v2801_v4 }
 0x3c8   : > { %2588 = vmatprep.subr.bf16.mxu1 %v3184_v8 }
 0x48d   : > { %v992_v33 = vpop.f32.mrb[0].mxu1 }
 0x48e   : > { %v993_v34 = vadd.f32 %v3687_v32, %v992_v33  ;;  %v2552_v35 = vpop.f32.mrb[1].mxu1 }
 0x48f   : > { %v995_v36 = vpop.f32.mrb[2].mxu1 }
 0x490   : > { %v2553_v37 = vpop.f32.mrb[3].mxu1  ;;  %v999_v38 = vsel %vm998_vm3, %v993_v34, -inf }
 0x491   : > { %1000 = vmax.xlane.f32.xlu1 %v999_v38  ;;  %v2418_v37 = vld [vmem:[#allocation11] ss:$0 sm:$0xff] }
 0x495   : > { %v1104_v39 = vpop.f32.mrb[4].mxu1 }
 0x496   : > { %v1105_v40 = vadd.f32 %v3687_v32, %v1104_v39  ;;  %v2564_v41 = vpop.f32.mrb[5].mxu1  ;;  %v2419_v39 = vld [vmem:[#allocation13] ss:$0 sm:$0xff] }
 0x497   : > { %v1107_v42 = vpop.f32.mrb[6].mxu1 }
 0x498   : > { %v2565_v43 = vpop.f32.mrb[7].mxu1  ;;  %v1110_v44 = vsel %vm998_vm3, %v1105_v40, -inf }
 0x499   : > { %1111 = vmax.xlane.f32.xlu0 %v1110_v44  ;;  %v2804_v43 = vld [vmem:[%s3953_s13] sm:$0xff]   ;;  %v2805_v44 = vld [vmem:[%s3953_s13 + $0x8] sm:$0xff]  }
 0x4af   : > { %1122 = vrot.lane.b32.xlu0 %v941_v25, %s3189_s9 }
 0x51e   : > { %v1001_v45 = vpop.xlane.xlu1 %1000 }
 0x51f   : > { %v1002_v46 = vsub.f32 %v993_v34, %v1001_v45  ;;  %v2806_v45 = vld [vmem:[%s3953_s13 + $0x10] sm:$0xff]  }
 0x521   : > { %v1003_v47 = vmul.f32 1.442695, %v1002_v46  ;;  %v2807_v46 = vld [vmem:[%s3953_s13 + $0x18] sm:$0xff]  }
 0x523   : > { %2824 = vpow2.f32 %v1003_v47  ;;  %v2420_v47 = vld [vmem:[#allocation14] ss:$0 sm:$0xff] }
 0x526   : > { %v1112_v48 = vpop.xlane.xlu0 %1111 }
 0x527   : > { %v1113_v49 = vsub.f32 %v1105_v40, %v1112_v48 }
 0x529   : > { %v1114_v50 = vmul.f32 1.442695, %v1113_v49 }
 0x52a   : > { %v1123_v61 = vpop.permute.xlu0 %1122 }
 0x52b   : > { %2826 = vpow2.f32 %v1114_v50  ;;  %v1128_v63 = vsel %vm1016_vm4, %v1123_v61, 0 }
 0x52d   : > { %v2825_v51 = vpop.eup %2824 }
 0x52e   : > { %v1005_v52 = vsel %vm998_vm3, %v2825_v51, 0.0 }
 0x52f   : > { %1006 = vadd.xlane.f32.xlu1 %v1005_v52 }
 0x535   : > { %v2827_v53 = vpop.eup %2826 }
 0x536   : > { %v1116_v54 = vsel %vm998_vm3, %v2827_v53, 0.0 }
 0x537   : > { %1117 = vadd.xlane.f32.xlu1 %v1116_v54 }
 0x548   : > { %1011 = vrot.lane.b32.xlu1 %v941_v25, %s3190_s26 }
 0x5bc   : > { %v1007_v55 = vpop.xlane.xlu1 %1006 }
 0x5bd   : > { %2828 = vrcp.f32 %v1007_v55 }
 0x5c4   : > { %v1118_v56 = vpop.xlane.xlu1 %1117 }
 0x5c5   : > { %2830 = vrcp.f32 %v1118_v56 }
 0x5c7   : > { %v2829_v57 = vpop.eup %2828 }
 0x5c8   : > { %v1009_v58 = vmul.f32 %v2829_v57, %v2825_v51  ;;  %v1012_v59 = vpop.permute.xlu1 %1011 }
 0x5c9   : > { %v1018_v60 = vsel %vm1016_vm4, %v1012_v59, 0 }
 0x5ca   : > { %2555 = vmatpush3.bf16.msra.mxu0 %v1018_v60  ;;  %v1010_v62 = vpack.c.bf16 %v1009_v58, %v1009_v58 }
 0x5cb   : > { %2566 = vmatprep.subr.bf16.mxu0 %v3184_v8 }
 0x5cd   : > { %2557 = vmatmul.mubr.msk.bf16.vlgmr.msra.gmra.mrb[4].mxu0 %vm998_vm3, %v1010_v62 }
 0x5ce   : > { %2567 = vmatpush3.bf16.msra.mxu0 %v1128_v63  ;;  %2568 = vmatprep.mubr.msk.bf16.mxu0 %vm3185_vm1, %v3184_v8  ;;  %v2424_v63 = vld [vmem:[%s3954_s14] ss:$0 sm:$0xff] }
 0x5cf   : > { %v2831_v0 = vpop.eup %2830  ;;  %2580 = vmatprep.subr.bf16.mxu0 %v3184_v8 }
 0x5d0   : > { %v1120_v1 = vmul.f32 %v2831_v0, %v2827_v53 }
 0x5d2   : > { %v1121_v2 = vpack.c.bf16 %v1120_v1, %v1120_v1 }
 0x5d5   : > { %2569 = vmatmul.mubr.msk.bf16.vlgmr.msra.gmra.mrb[8].mxu0 %vm998_vm3, %v1121_v2 }
 0x5d6   : > { %2584 = vmatprep.mubr.msk.bf16.mxu0 %vm3185_vm1, %v3184_v8  ;;  %2581 = vmatpush3.bf16.msra.mxu0 %v2802_v31 }
 0x5d7   : > { %2582 = vmatprep.subr.bf16.mxu0 %v3184_v8 }
 0x6a0   : > { %v1054_v5 = vpop.f32.mrb[4].mxu0 }
 0x6a1   : > { %v2558_v6 = vpop.f32.mrb[5].mxu0 }
 0x6a2   : > { %v1057_v7 = vpop.f32.mrb[6].mxu0 }
 0x6a3   : > { %v2559_v9 = vpop.f32.mrb[7].mxu0 }
 0x6a8   : > { %v1164_v10 = vpop.f32.mrb[8].mxu0 }
 0x6a9   : > { %1171 = vrot.lane.b32.xlu1 %v1164_v10, %s3191_s0  ;;  %v2570_v11 = vpop.f32.mrb[9].mxu0 }
 0x6aa   : > { %v1167_v12 = vpop.f32.mrb[10].mxu0 }
 0x6ab   : > { %v2571_v13 = vpop.f32.mrb[11].mxu0 }
 0x6ac   : > { %v2808_v13 = vld [vmem:[%s4029_s17 + $0x10] sm:$0xff]  }
 0x71b   : > { %v1172_v14 = vpop.permute.xlu1 %1171 }
 0x71c   : > { %v1174_v15 = vsel %vm951_vm2, %v1054_v5, %v1172_v14  ;;  %v2809_v14 = vld [vmem:[%s4029_s17 + $0x18] sm:$0xff]  }
 0x71d   : > { %v1179_v16 = vpack.c.bf16 %v1174_v15, %v1174_v15 }
 0x71f   : > { %2577 = vmatmul.mubr.msk.bf16.vlgmr.msra.gmra.mrb[8].mxu1 %vm844_vm0, %v1179_v16 }
 0x720   : > { %2596 = vmatprep.mubr.msk.bf16.mxu1 %vm3185_vm1, %v3184_v8  ;;  %2589 = vmatpush3.bf16.msra.mxu1 %v2804_v43 }
 0x721   : > { %2590 = vmatprep.subr.bf16.mxu1 %v3184_v8 }
 0x724   : > { %2591 = vmatpush3.bf16.msra.mxu1 %v2805_v44 }
 0x725   : > { %2592 = vmatprep.subr.bf16.mxu1 %v3184_v8 }
 0x728   : > { %2593 = vmatpush3.bf16.msra.mxu1 %v2806_v45 }
 0x729   : > { %2594 = vmatprep.subr.bf16.mxu1 %v3184_v8 }
 0x72c   : > { %2595 = vmatpush3.bf16.msra.mxu1 %v2807_v46 }
 0x72d   : > { %2614 = vmatprep.subr.bf16.mxu1 %v3184_v8 }
 0x7f2   : > { %v1236_v19 = vpop.f32.mrb[8].mxu1 }
 0x7f3   : > { %v1237_v20 = vadd.f32 %v2414_v17, %v1236_v19  ;;  %v2578_v21 = vpop.f32.mrb[9].mxu1 }
 0x7f4   : > { %v1239_v22 = vpop.f32.mrb[10].mxu1 }
 0x7f5   : > { %v2579_v23 = vpop.f32.mrb[11].mxu1  ;;  %v1242_v24 = vadd.f32 %v1237_v20, %v3665_v18  ;;  %v2803_v18 = vld [vmem:[%s3951_s11 + $0x8] sm:$0xff]   ;;  %v2430_v20 = vld [vmem:[%s4031_s20] ss:$0 sm:$0xff] }
 0x7f6   : > { %2583 = vmatpush3.bf16.msra.mxu0 %v2803_v18  ;;  %v2431_v22 = vld [vmem:[%s4032_s19] ss:$0 sm:$0xff] }
 0x7f7   : > { %v1245_v25 = vsel %vm844_vm0, %v1242_v24, 0.0  ;;  %2600 = vmatprep.subr.bf16.mxu0 %v3184_v8 }
 0x7f8   : > { %1246 = vadd.xlane.f32.xlu1 %v1245_v25 }
 0x885   : > { %v1247_v26 = vpop.xlane.xlu1 %1246 }
 0x886   : > { %v1248_v27 = vmul.f32 0.03125, %v1247_v26  ;;  %v2436_v26 = vld [vmem:[#allocation8 + $0x1] ss:$0 sm:$0xff] }
 0x888   : > { %v1249_v28 = vsub.f32 %v1242_v24, %v1248_v27 }
 0x88a   : > { %v1250_v29 = vmul.f32 %v1249_v28, %v1249_v28 }
 0x88c   : > { %v1251_v30 = vsel %vm844_vm0, %v1250_v29, 0.0 }
 0x88d   : > { %1252 = vadd.xlane.f32.xlu0 %v1251_v30 }
 0x91a   : > { %v1253_v33 = vpop.xlane.xlu0 %1252 }
 0x91b   : > { %v1254_v34 = vmul.f32 0.03125, %v1253_v33 }
 0x91d   : > { %v1255_v35 = vadd.f32 1e-12, %v1254_v34 }
 0x91f   : > { %2832 = vrsqrt.f32 %v1255_v35 }
 0x929   : > { %v2833_v36 = vpop.eup %2832 }
 0x92a   : > { %v1257_v38 = vmul.f32 %v2833_v36, %v1249_v28 }
 0x92c   : > { %v1264_v40 = vmul.f32 %v2418_v37, %v1257_v38 }
 0x92e   : > { %v1271_v41 = vadd.f32 %v2419_v39, %v1264_v40 }
 0x930   : > { %v1276_v42 = vpack.c.bf16 %v1271_v41, %v1271_v41 }
 0x932   : > { %2585 = vmatmul.mubr.msk.bf16.vlgmr.msra.gmra.mrb[12].mxu0 %vm844_vm0, %v1276_v42 }
 0x933   : > { %2604 = vmatprep.mubr.msk.bf16.mxu0 %vm3185_vm1, %v3184_v8  ;;  %2601 = vmatpush3.bf16.msra.mxu0 %v2808_v13 }
 0x934   : > { %2602 = vmatprep.subr.bf16.mxu0 %v3184_v8 }
 0x937   : > { %2603 = vmatpush3.bf16.msra.mxu0 %v2809_v14 }
 0x938   : > { %2608 = vmatprep.subr.bf16.mxu0 %v3184_v8 }
 0xa05   : > { %v1333_v48 = vpop.f32.mrb[12].mxu0 }
 0xa06   : > { %v1334_v49 = vadd.f32 %v2420_v47, %v1333_v48  ;;  %v2586_v50 = vpop.f32.mrb[13].mxu0 }
 0xa07   : > { %v1336_v51 = vpop.f32.mrb[14].mxu0 }
 0xa08   : > { %v1340_v52 = vmul.f32 0.044715, %v1334_v49  ;;  %v2587_v53 = vpop.f32.mrb[15].mxu0  ;;  %v1339_v59 = vmul.f32 0.5, %v1334_v49 }
 0xa0a   : > { %v1341_v54 = vmul.f32 %v1340_v52, %v1334_v49 }
 0xa0c   : > { %v1342_v55 = vmul.f32 %v1341_v54, %v1334_v49 }
 0xa0e   : > { %v1343_v56 = vadd.f32 %v1342_v55, %v1334_v49 }
 0xa10   : > { %v1344_v57 = vmul.f32 0.7978846, %v1343_v56 }
 0xa12   : > { %2834 = vtanh.f32 %v1344_v57 }
 0xa1c   : > { %v2835_v58 = vpop.eup %2834 }
 0xa1d   : > { %v1346_v60 = vadd.f32 1.0, %v2835_v58 }
 0xa1f   : > { %v1347_v61 = vmul.f32 %v1346_v60, %v1339_v59 }
 0xa21   : > { %v1356_v62 = vpack.c.bf16 %v1347_v61, %v1347_v61 }
 0xa23   : > { %2597 = vmatmul.mubr.msk.bf16.vlgmr.msra.gmra.mrb[12].mxu1 %vm1388_vm5, %v1356_v62 }
 0xa24   : > { %2616 = vmatprep.mubr.msk.bf16.mxu1 %vm3185_vm1, %v3184_v8 }
 0xaf6   : > { %v1426_v0 = vpop.f32.mrb[12].mxu1 }
 0xaf7   : > { %v1427_v1 = vadd.f32 %v2424_v63, %v1426_v0  ;;  %v2598_v2 = vpop.f32.mrb[13].mxu1 }
 0xaf8   : > { %v1429_v3 = vpop.f32.mrb[14].mxu1 }
 0xaf9   : > { %v2599_v4 = vpop.f32.mrb[15].mxu1  ;;  %v1432_v5 = vadd.f32 %v1427_v1, %v1271_v41 }
 0xafb   : > { %v1435_v6 = vsel %vm844_vm0, %v1432_v5, 0.0 }
 0xafc   : > { %1436 = vadd.xlane.f32.xlu1 %v1435_v6 }
 0xb89   : > { %v1437_v7 = vpop.xlane.xlu1 %1436 }
 0xb8a   : > { %v1438_v9 = vmul.f32 0.03125, %v1437_v7  ;;  %v2810_v7 = vld [vmem:[%s3947_s7 + $0x10] sm:$0xff]  }
 0xb8c   : > { %v1439_v10 = vsub.f32 %v1432_v5, %v1438_v9  ;;  %v2811_v9 = vld [vmem:[%s3947_s7 + $0x18] sm:$0xff]  }
 0xb8e   : > { %v1440_v11 = vmul.f32 %v1439_v10, %v1439_v10 }
 0xb90   : > { %v1441_v12 = vsel %vm844_vm0, %v1440_v11, 0.0 }
 0xb91   : > { %1442 = vadd.xlane.f32.xlu1 %v1441_v12 }
 0xc1e   : > { %v1443_v15 = vpop.xlane.xlu1 %1442 }
 0xc1f   : > { %v1444_v16 = vmul.f32 0.03125, %v1443_v15 }
 0xc21   : > { %v1445_v17 = vadd.f32 1e-12, %v1444_v16 }
 0xc23   : > { %2836 = vrsqrt.f32 %v1445_v17 }
 0xc2d   : > { %v2837_v19 = vpop.eup %2836 }
 0xc2e   : > { %v1447_v21 = vmul.f32 %v2837_v19, %v1439_v10 }
 0xc30   : > { %v1454_v23 = vmul.f32 %v2430_v20, %v1447_v21 }
 0xc32   : > { %v3772_v24 = vadd.f32 %v2431_v22, %v1454_v23  ;;  %v2448_v22 = vld [vmem:[#allocation10 + $0x1] ss:$0 sm:$0xff] }
 0xc34   : > { %v1467_v25 = vpack.c.bf16 %v3772_v24, %v3772_v24 }
 0xc36   : > { %2605 = vmatmul.mubr.msk.bf16.vlgmr.msra.gmra.mrb[16].mxu0 %vm844_vm0, %v1467_v25 }
 0xc37   : > { %2610 = vmatprep.mubr.msk.bf16.mxu0 %vm3185_vm1, %v3184_v8 }
 0xd09   : > { %v1525_v27 = vpop.f32.mrb[16].mxu0 }
 0xd0a   : > { %v1526_v28 = vadd.f32 %v2436_v26, %v1525_v27  ;;  %v2606_v29 = vpop.f32.mrb[17].mxu0 }
 0xd0b   : > { %v1528_v30 = vpop.f32.mrb[18].mxu0 }
 0xd0c   : > { %v1531_v31 = vpack.c.bf16 %v1526_v28, %v1526_v28  ;;  %v2607_v18 = vpop.f32.mrb[19].mxu0 }
 0xd0e   : > { %1643 = vrot.lane.b32.xlu1 %v1531_v31, %s3188_s18  ;;  %1533 = vrot.lane.b32.xlu0 %v1531_v31, %s3187_s12  ;;  %s4036_s18 = sld [smem:[#allocation41_spill]]  ;;  %s3192_s12 = smov [#allocation16]  }
 0xd12   : > { %1641 = vrot.lane.b32.xlu1 %v1531_v31, %s3186_s21  ;;  %s2195_s21 = scalar_lea.sflag [#allocation4], %s3608_s4 }
 0xd80   : > { %v1534_v33 = vpop.permute.xlu0 %1533  ;;  %v1644_v35 = vpop.permute.xlu1 %1643 }
 0xd81   : > { %v1539_v34 = vsel %vm951_vm2, %v1534_v33, 0  ;;  %v1649_v36 = vsel %vm951_vm2, %v1644_v35, 0 }
 0xd82   : > { %2609 = vmatpush3.bf16.xpose.msra.mxu0 %v1539_v34 }
 0xd83   : > { %2620 = vmatprep.subr.bf16.mxu0 %v3184_v8 }
 0xd84   : > { %v1642_v37 = vpop.permute.xlu1 %1641 }
 0xd89   : > { %2611 = vmatmul.mubr.msk.bf16.vlgmr.msra.gmra.mrb[20].mxu0 %vm951_vm2, %v1531_v31 }
 0xd8a   : > { %2621 = vmatpush3.bf16.xpose.msra.mxu0 %v1649_v36  ;;  %2622 = vmatprep.mubr.msk.bf16.mxu0 %vm3185_vm1, %v3184_v8  ;;  %v2812_v36 = vld [vmem:[%s3951_s11 + $0x10] sm:$0xff]  }
 0xd8b   : > { %2632 = vmatprep.subr.bf16.mxu0 %v3184_v8 }
 0xd91   : > { %2623 = vmatmul.mubr.msk.bf16.vlgmr.msra.gmra.mrb[24].mxu0 %vm951_vm2, %v1642_v37  ;;  %v2813_v37 = vld [vmem:[%s3951_s11 + $0x18] sm:$0xff]  }
 0xd92   : > { %2636 = vmatprep.mubr.msk.bf16.mxu0 %vm3185_vm1, %v3184_v8  ;;  %2633 = vmatpush3.bf16.msra.mxu0 %v2810_v7 }
 0xd93   : > { %2634 = vmatprep.subr.bf16.mxu0 %v3184_v8 }
 0xd96   : > { %2635 = vmatpush3.bf16.msra.mxu0 %v2811_v9 }
 0xd97   : > { %2648 = vmatprep.subr.bf16.mxu0 %v3184_v8 }
 0xe5c   : > { %v1575_v38 = vpop.f32.mrb[20].mxu0 }
 0xe5d   : > { %v1576_v39 = vadd.f32 %v3687_v32, %v1575_v38  ;;  %v2612_v40 = vpop.f32.mrb[21].mxu0 }
 0xe5e   : > { %v1578_v41 = vpop.f32.mrb[22].mxu0 }
 0xe5f   : > { %v2613_v42 = vpop.f32.mrb[23].mxu0  ;;  %v1581_v43 = vsel %vm998_vm3, %v1576_v39, -inf  ;;  %v2452_v41 = vld [vmem:[#allocation11 + $0x1] ss:$0 sm:$0xff] }
 0xe60   : > { %1582 = vmax.xlane.f32.xlu0 %v1581_v43  ;;  %v2453_v43 = vld [vmem:[#allocation13 + $0x1] ss:$0 sm:$0xff] }
 0xe64   : > { %v1685_v44 = vpop.f32.mrb[24].mxu0 }
 0xe65   : > { %v1686_v45 = vadd.f32 %v3687_v32, %v1685_v44  ;;  %v2624_v46 = vpop.f32.mrb[25].mxu0 }
 0xe66   : > { %v1688_v47 = vpop.f32.mrb[26].mxu0 }
 0xe67   : > { %v2625_v48 = vpop.f32.mrb[27].mxu0  ;;  %v1691_v49 = vsel %vm998_vm3, %v1686_v45, -inf  ;;  %v2814_v47 = vld [vmem:[%s3953_s13 + $0x20] sm:$0xff]  }
 0xe68   : > { %1692 = vmax.xlane.f32.xlu1 %v1691_v49  ;;  %v2815_v48 = vld [vmem:[%s3953_s13 + $0x28] sm:$0xff]   ;;  %v2816_v49 = vld [vmem:[%s3953_s13 + $0x30] sm:$0xff]  }
 0xe79   : > { %1593 = vrot.lane.b32.xlu1 %v1531_v31, %s3190_s26  ;;  %s2487_s26 = sshll.u32 %s3329_s23, 4 }
 0xeed   : > { %v1583_v50 = vpop.xlane.xlu0 %1582 }
 0xeee   : > { %v1584_v51 = vsub.f32 %v1576_v39, %v1583_v50  ;;  %v2817_v50 = vld [vmem:[%s3953_s13 + $0x38] sm:$0xff]  }
 0xef0   : > { %v1585_v52 = vmul.f32 1.442695, %v1584_v51  ;;  %v2458_v51 = vld [vmem:[#allocation14 + $0x1] ss:$0 sm:$0xff] }
 0xef2   : > { %2838 = vpow2.f32 %v1585_v52 }
 0xef5   : > { %v1693_v53 = vpop.xlane.xlu1 %1692 }
 0xef6   : > { %v1694_v54 = vsub.f32 %v1686_v45, %v1693_v53 }
 0xef8   : > { %v1695_v55 = vmul.f32 1.442695, %v1694_v54 }
 0xef9   : > { %v1594_v56 = vpop.permute.xlu1 %1593 }
 0xefa   : > { %2840 = vpow2.f32 %v1695_v55  ;;  %v1599_v57 = vsel %vm1016_vm4, %v1594_v56, 0 }
 0xefb   : > { %2615 = vmatpush3.bf16.msra.mxu1 %v1599_v57 }
 0xefc   : > { %v2839_v32 = vpop.eup %2838  ;;  %2626 = vmatprep.subr.bf16.mxu1 %v3184_v8 }
 0xefd   : > { %v1587_v58 = vsel %vm998_vm3, %v2839_v32, 0.0 }
 0xefe   : > { %1588 = vadd.xlane.f32.xlu0 %v1587_v58 }
 0xf04   : > { %v2841_v59 = vpop.eup %2840 }
 0xf05   : > { %v1697_v60 = vsel %vm998_vm3, %v2841_v59, 0.0 }
 0xf06   : > { %1698 = vadd.xlane.f32.xlu0 %v1697_v60 }
 0xf1c   : > { %1703 = vrot.lane.b32.xlu0 %v1531_v31, %s3189_s9  ;;  %s827_s9 = scalar_lea.vmem [#allocation16], %s3608_s4 }
 0xf1d   : > { %s2210_s22 = sshll.u32 %s827_s9, 4  ;;  %s2211_s22 = int_to_ptr.vmem [resolvable:$true] %s2210_s22 }
 0xf8b   : > { %v1589_v61 = vpop.xlane.xlu0 %1588 }
 0xf8c   : > { %2842 = vrcp.f32 %v1589_v61 }
 0xf93   : > { %v1699_v62 = vpop.xlane.xlu0 %1698 }
 0xf94   : > { %2844 = vrcp.f32 %v1699_v62 }
 0xf96   : > { %v2843_v63 = vpop.eup %2842 }
 0xf97   : > { %v1591_v0 = vmul.f32 %v2843_v63, %v2839_v32  ;;  %v1704_v1 = vpop.permute.xlu0 %1703 }
 0xf98   : > { %v1709_v3 = vsel %vm1016_vm4, %v1704_v1, 0 }
 0xf99   : > { %v1592_v2 = vpack.c.bf16 %v1591_v0, %v1591_v0 }
 0xf9b   : > { %2617 = vmatmul.mubr.msk.bf16.vlgmr.msra.gmra.mrb[16].mxu1 %vm998_vm3, %v1592_v2  ;;  %v2471_v2 = vld [vmem:[%s3954_s14 + $0x1] ss:$0 sm:$0xff] }
 0xf9c   : > { %2627 = vmatpush3.bf16.msra.mxu1 %v1709_v3  ;;  %2628 = vmatprep.mubr.msk.bf16.mxu1 %vm3185_vm1, %v3184_v8 }
 0xf9d   : > { %2640 = vmatprep.subr.bf16.mxu1 %v3184_v8 }
 0xf9e   : > { %v2845_v4 = vpop.eup %2844 }
 0xf9f   : > { %v1701_v5 = vmul.f32 %v2845_v4, %v2841_v59 }
 0xfa1   : > { %v1702_v6 = vpack.c.bf16 %v1701_v5, %v1701_v5 }
 0xfa3   : > { %2629 = vmatmul.mubr.msk.bf16.vlgmr.msra.gmra.mrb[20].mxu1 %vm998_vm3, %v1702_v6 }
 0xfa4   : > { %2644 = vmatprep.mubr.msk.bf16.mxu1 %vm3185_vm1, %v3184_v8  ;;  %2641 = vmatpush3.bf16.msra.mxu1 %v2812_v36 }
 0xfa5   : > { %2642 = vmatprep.subr.bf16.mxu1 %v3184_v8 }
 0xfa8   : > { %2643 = vmatpush3.bf16.msra.mxu1 %v2813_v37 }
 0xfa9   : > { %2660 = vmatprep.subr.bf16.mxu1 %v3184_v8 }
0x106e   : > { %v1635_v10 = vpop.f32.mrb[16].mxu1 }
0x106f   : > { %v2618_v11 = vpop.f32.mrb[17].mxu1 }
0x1070   : > { %v1638_v12 = vpop.f32.mrb[18].mxu1 }
0x1071   : > { %v2619_v13 = vpop.f32.mrb[19].mxu1 }
0x1076   : > { %v1745_v14 = vpop.f32.mrb[20].mxu1 }
0x1077   : > { %1752 = vrot.lane.b32.xlu1 %v1745_v14, %s3191_s0  ;;  %v2630_v15 = vpop.f32.mrb[21].mxu1  ;;  %s4034_s0 = sld [smem:[#allocation40_spill]] }
0x1078   : > { %v1748_v16 = vpop.f32.mrb[22].mxu1 }
0x1079   : > { %v2631_v17 = vpop.f32.mrb[23].mxu1  ;;  %v2818_v16 = vld [vmem:[%s4033_s27] sm:$0xff]  }
0x107a   : > { %v2819_v17 = vld [vmem:[%s4033_s27 + $0x8] sm:$0xff]  }
0x10e9   : > { %v1753_v19 = vpop.permute.xlu1 %1752 }
0x10ea   : > { %v1755_v20 = vsel %vm951_vm2, %v1635_v10, %v1753_v19 }
0x10eb   : > { %v1761_v21 = vpack.c.bf16 %v1755_v20, %v1755_v20 }
0x10ed   : > { %2637 = vmatmul.mubr.msk.bf16.vlgmr.msra.gmra.mrb[28].mxu0 %vm844_vm0, %v1761_v21 }
0x10ee   : > { %2656 = vmatprep.mubr.msk.bf16.mxu0 %vm3185_vm1, %v3184_v8  ;;  %2649 = vmatpush3.bf16.msra.mxu0 %v2814_v47 }
0x10ef   : > { %2650 = vmatprep.subr.bf16.mxu0 %v3184_v8 }
0x10f2   : > { %2651 = vmatpush3.bf16.msra.mxu0 %v2815_v48 }
0x10f3   : > { %2652 = vmatprep.subr.bf16.mxu0 %v3184_v8 }
0x10f6   : > { %2653 = vmatpush3.bf16.msra.mxu0 %v2816_v49  ;;  %v2177_v49 = vld [vmem:[%s739_s1] sm:$0x1]  ;;  %s3086_s1 = scalar_lea.vmem %s2211_s22, 16 }
0x10f7   : > { %2654 = vmatprep.subr.bf16.mxu0 %v3184_v8  ;;  %p3087_p11 = scmp.ne.s32.totalorder %s2211_s22, %s3086_s1 }
0x10f9   : > { %p3088_p7 = pnand %p3087_p11, %p4038_p5 }
0x10fa   : > { %2655 = vmatpush3.bf16.msra.mxu0 %v2817_v50 }
0x10fb   : > { %p3089_p3 = pneg %p3088_p7 }
0x11c0   : > { %v1819_v23 = vpop.f32.mrb[28].mxu0 }
0x11c1   : > { %v1820_v25 = vadd.f32 %v2448_v22, %v1819_v23  ;;  %v2638_v26 = vpop.f32.mrb[29].mxu0  ;;  %v2479_v23 = vld [vmem:[%s4031_s20 + $0x1] ss:$0 sm:$0xff] }
0x11c2   : > { %v1822_v27 = vpop.f32.mrb[30].mxu0  ;;  %v2480_v26 = vld [vmem:[%s4032_s19 + $0x1] ss:$0 sm:$0xff] }
0x11c3   : > { %v2639_v28 = vpop.f32.mrb[31].mxu0  ;;  %v1825_v29 = vadd.f32 %v1820_v25, %v3772_v24 }
0x11c5   : > { %v1830_v30 = vsel %vm844_vm0, %v1825_v29, 0.0 }
0x11c6   : > { %1831 = vadd.xlane.f32.xlu1 %v1830_v30  ;;  %v2820_v30 = vld [vmem:[%s4034_s0] sm:$0xff]  }
0x1253   : > { %v1832_v31 = vpop.xlane.xlu1 %1831 }
0x1254   : > { %v1833_v18 = vmul.f32 0.03125, %v1832_v31  ;;  %v2821_v31 = vld [vmem:[%s4034_s0 + $0x8] sm:$0xff]  }
0x1256   : > { %v1834_v33 = vsub.f32 %v1825_v29, %v1833_v18  ;;  %v2057_v18 = vld [vmem:[%s4035_s15] sm:$0x1]  ;;  %s3898_s15 = scalar_lea.hbm %s4037_s10, %s2487_s26 }
0x1258   : > { %v1835_v34 = vmul.f32 %v1834_v33, %v1834_v33 }
0x125a   : > { %v1836_v35 = vsel %vm844_vm0, %v1835_v34, 0.0 }
0x125b   : > { %1837 = vadd.xlane.f32.xlu0 %v1836_v35 }
0x12e8   : > { %v1838_v24 = vpop.xlane.xlu0 %1837 }
0x12e9   : > { %v1839_v38 = vmul.f32 0.03125, %v1838_v24 }
0x12eb   : > { %v1840_v39 = vadd.f32 1e-12, %v1839_v38 }
0x12ed   : > { %2846 = vrsqrt.f32 %v1840_v39 }
0x12f7   : > { %v2847_v40 = vpop.eup %2846 }
0x12f8   : > { %v1842_v42 = vmul.f32 %v2847_v40, %v1834_v33 }
0x12fa   : > { %v1849_v44 = vmul.f32 %v2452_v41, %v1842_v42 }
0x12fc   : > { %v1856_v45 = vadd.f32 %v2453_v43, %v1849_v44 }
0x12fe   : > { %v1862_v46 = vpack.c.bf16 %v1856_v45, %v1856_v45 }
0x1300   : > { %2645 = vmatmul.mubr.msk.bf16.vlgmr.msra.gmra.mrb[24].mxu1 %vm844_vm0, %v1862_v46 }
0x1301   : > { %2664 = vmatprep.mubr.msk.bf16.mxu1 %vm3185_vm1, %v3184_v8  ;;  %2661 = vmatpush3.bf16.msra.mxu1 %v2818_v16 }
0x1302   : > { %2662 = vmatprep.subr.bf16.mxu1 %v3184_v8 }
0x1305   : > { %2663 = vmatpush3.bf16.msra.mxu1 %v2819_v17 }
0x1306   : > { %2668 = vmatprep.subr.bf16.mxu1 %v3184_v8 }
0x13d3   : > { %v1920_v52 = vpop.f32.mrb[24].mxu1 }
0x13d4   : > { %v1921_v53 = vadd.f32 %v2458_v51, %v1920_v52  ;;  %v2646_v54 = vpop.f32.mrb[25].mxu1 }
0x13d5   : > { %v1923_v55 = vpop.f32.mrb[26].mxu1 }
0x13d6   : > { %v1927_v56 = vmul.f32 0.044715, %v1921_v53  ;;  %v2647_v57 = vpop.f32.mrb[27].mxu1  ;;  %v1926_v62 = vmul.f32 0.5, %v1921_v53 }
0x13d8   : > { %v1928_v32 = vmul.f32 %v1927_v56, %v1921_v53 }
0x13da   : > { %v1929_v58 = vmul.f32 %v1928_v32, %v1921_v53 }
0x13dc   : > { %v1930_v59 = vadd.f32 %v1929_v58, %v1921_v53 }
0x13de   : > { %v1931_v60 = vmul.f32 0.7978846, %v1930_v59 }
0x13e0   : > { %2848 = vtanh.f32 %v1931_v60 }
0x13ea   : > { %v2849_v61 = vpop.eup %2848 }
0x13eb   : > { %v1933_v63 = vadd.f32 1.0, %v2849_v61 }
0x13ed   : > { %v1934_v0 = vmul.f32 %v1933_v63, %v1926_v62 }
0x13ef   : > { %v1944_v1 = vpack.c.bf16 %v1934_v0, %v1934_v0 }
0x13f1   : > { %2657 = vmatmul.mubr.msk.bf16.vlgmr.msra.gmra.mrb[32].mxu0 %vm1388_vm5, %v1944_v1 }
0x14c4   : > { %v2014_v3 = vpop.f32.mrb[32].mxu0 }
0x14c5   : > { %v2015_v4 = vadd.f32 %v2471_v2, %v2014_v3  ;;  %v2658_v5 = vpop.f32.mrb[33].mxu0 }
0x14c6   : > { %v2017_v6 = vpop.f32.mrb[34].mxu0 }
0x14c7   : > { %v2659_v7 = vpop.f32.mrb[35].mxu0  ;;  %v2020_v9 = vadd.f32 %v2015_v4, %v1856_v45 }
0x14c9   : > { %v2025_v10 = vsel %vm844_vm0, %v2020_v9, 0.0 }
0x14ca   : > { %2026 = vadd.xlane.f32.xlu0 %v2025_v10 }
0x1557   : > { %v2027_v11 = vpop.xlane.xlu0 %2026 }
0x1558   : > { %v2028_v12 = vmul.f32 0.03125, %v2027_v11 }
0x155a   : > { %v2029_v13 = vsub.f32 %v2020_v9, %v2028_v12 }
0x155c   : > { %v2030_v14 = vmul.f32 %v2029_v13, %v2029_v13 }
0x155e   : > { %v2031_v15 = vsel %vm844_vm0, %v2030_v14, 0.0 }
0x155f   : > { %2032 = vadd.xlane.f32.xlu1 %v2031_v15 }
0x15ec   : > { %v2033_v19 = vpop.xlane.xlu1 %2032 }
0x15ed   : > { %v2034_v20 = vmul.f32 0.03125, %v2033_v19 }
0x15ef   : > { %v2035_v21 = vadd.f32 1e-12, %v2034_v20 }
0x15f1   : > { %2850 = vrsqrt.f32 %v2035_v21 }
0x15fb   : > { %v2851_v22 = vpop.eup %2850 }
0x15fc   : > { %v2037_v25 = vmul.f32 %v2851_v22, %v2029_v13 }
0x15fe   : > { %v2044_v27 = vmul.f32 %v2479_v23, %v2037_v25 }
0x1600   : > { %v2051_v28 = vadd.f32 %v2480_v26, %v2044_v27 }
0x1602   : > { %v2056_v29 = vpack.c.bf16 %v2051_v28, %v2051_v28 }
0x1604   : > { %2665 = vmatmul.mubr.msk.bf16.vlgmr.msra.gmra.mrb[28].mxu1 %vm844_vm0, %v2056_v29 }
0x1605   : > { %2672 = vmatprep.mubr.msk.bf16.mxu1 %vm3185_vm1, %v3184_v8  ;;  %2669 = vmatpush3.bf16.msra.mxu1 %v2820_v30 }
0x1606   : > { %2670 = vmatprep.subr.bf16.mxu1 %v3184_v8  ;;  %v2119_v8 = vld [vmem:[%s4036_s18] sm:$0x1]  ;;  %s3090_s18 = sshll.u32 %s3192_s12, 4  ;;  %s3091_s18 = int_to_ptr.vmem [resolvable:$false] %s3090_s18 }
0x1607   : > { %s3092_s0 = scalar_lea.vmem %s3091_s18, 32  ;;  %p3093_p8 = scmp.lt.s32.totalorder %s2211_s22, %s3091_s18 }
0x1608   : > { %p3094_p6 = scmp.lt.s32.totalorder %s3092_s0, %s3086_s1 }
0x1609   : > { %2671 = vmatpush3.bf16.msra.mxu1 %v2821_v31 }
0x160a   : > { %p3095_p12 = por %p3094_p6, %p3093_p8 }
0x160c   : > { %p3096_p9 = pnand %p3095_p12, %p3089_p3 }
0x16d7   : > { %v2107_v33 = vpop.f32.mrb[28].mxu1 }
0x16d8   : > { %v2108_v34 = vadd.f32 %v2107_v33, %v2057_v18  ;;  %v2666_v35 = vpop.f32.mrb[29].mxu1 }
0x16d9   : > { %v2110_v36 = vpop.f32.mrb[30].mxu1 }
0x16da   : > { %2852 = vtanh.f32 %v2108_v34  ;;  %v2667_v37 = vpop.f32.mrb[31].mxu1 }
0x16e4   : > { %v2853_v24 = vpop.eup %2852 }
0x16e5   : > { %v2118_v38 = vpack.c.bf16 %v2853_v24, %v2853_v24 }
0x16e7   : > { %2673 = vmatmul.mubr.msk.bf16.vlgmr.msra.gmra.mrb[32].mxu1 %vm844_vm0, %v2118_v38 }
0x17ba   : > { %v2169_v39 = vpop.f32.mrb[32].mxu1 }
0x17bb   : > { %v2170_v40 = vadd.f32 %v2169_v39, %v2119_v8  ;;  %v2674_v41 = vpop.f32.mrb[33].mxu1 }
0x17bc   : > { %v2172_v42 = vpop.f32.mrb[34].mxu1 }
0x17bd   : > { %v2181_v43 = vand.u32 2147483647, %v2170_v40  ;;  %v2675_v44 = vpop.f32.mrb[35].mxu1  ;;  %2176 = vst.msk [vmem:[%s827_s9] sm:$0x1] %vm2175_vm6, %v2170_v40  ;;  %v2178_v50 = vmax.f32 %v2170_v40, 0.0  ;;  %v2179_v51 = vmul.f32 %v2177_v49, %v2170_v40 }
0x17bf   : > { %v2182_v45 = vsub.f32 0.0, %v2181_v43  ;;  %v2180_v53 = vsub.f32 %v2178_v50, %v2179_v51 }
0x17c1   : > { %v2183_v46 = vmul.f32 1.442695, %v2182_v45 }
0x17c3   : > { %2854 = vpow2.f32 %v2183_v46 }
0x17cd   : > { %v2855_v47 = vpop.eup %2854 }
0x17ce   : > { %v2185_v48 = vadd.f32 1.0, %v2855_v47 }
0x17d0   : > { %2856 = vlog2.f32 %v2185_v48 }
0x17da   : > { %v2857_v52 = vpop.eup %2856 }
0x17db   : > { %v2187_v54 = vmul.f32 0.6931472, %v2857_v52 }
0x17dd   : > { %v2188_v55 = vadd.f32 %v2187_v54, %v2180_v53 }
0x17df   : > { %v2189_v56 = vsel %vm2175_vm6, %v2188_v55, 0.0 }
0x17e0   : > { %2190 = vadd.xlane.f32.xlu0 %v2189_v56 }
0x17e1   : > { %3099 = shalt.err (!%p3096_p9)
}
0x17e2   : > { %s3100_s23 = scalar_lea.hbm %s3898_s15, 16  ;;  %s3104_s26 = scalar_lea.hbm %s4037_s10, 32 }
0x17e3   : > { %p3101_p4 = scmp.ne.s32.totalorder %s3898_s15, %s3100_s23  ;;  %p3105_p0 = scmp.lt.u32.totalorder %s3898_s15, %s4037_s10 }
0x17e4   : > { %p3106_p2 = scmp.lt.u32.totalorder %s3104_s26, %s3100_s23  ;;  %p3108_p11 = scmp.lt.u32.totalorder %s3100_s23, %s3898_s15 }
0x17e5   : > { %p3102_p1 = pnand %p3101_p4, %p4038_p5 }
0x17e6   : > { %p3107_p10 = por %p3106_p2, %p3105_p0 }
0x17e7   : > { %p3103_p13 = pneg %p3102_p1 }
0x17e8   : > { %p3109_p7 = por %p3108_p11, %p3107_p10 }
0x17ea   : > { %p3110_p3 = pnand %p3109_p7, %p3103_p13 }
0x17ec   : > { %3113 = shalt.err (!%p3110_p3)
}
0x17ed   : > { %2704 = dma.vmem_to_hbm [thread:$0]  (%p4038_p5), %s2211_s22, 16, %s3898_s15, %s2195_s21   ;;  %vm2192_vm7 = vcmask 0  }
0x17ee   : > { %s4039_s12 = sld [smem:[#allocation43_spill]] }
0x17f4   : > { %s839_s18 = scalar_lea.vmem %s4039_s12, %s3640_s16 }
0x186d   : > { %v2191_v57 = vpop.xlane.xlu0 %2190 }
0x186e   : > { %2193 = vst.msk [vmem:[%s839_s18] sm:$0x1] %vm2192_vm7, %v2191_v57 }
0x186f PF: > { %s2225_s23 = sand.u32 1, %s3160_s3   ;;  %p4040_p8 = scmp.ne.s32.totalorder %s4014_s2, 0 }
0x1870   : > { %p4041_p6 = scmp.ge.s32.totalorder %s3172_s30, 2  ;;  %s2226_s4 = scalar_lea.sflag [#allocation4], %s2225_s23 }
0x1872   : > { %p2733_p12 = pnand %p4041_p6, %p4040_p8 }
0x1874   : > { %3155 = dma.done.wait (!%p2733_p12), %s2226_s4, 16  }
0x1875   : > { %3157 = vsyncadd (!%p2733_p12), %s2226_s4, 4294967280  ;;  %s4042_s25 = sld [smem:[#allocation24_spill]]  ;;  %p42_p5 = scmp.ge.s32.totalorder %s3500_s5, 4  }
0x1876   : > { %s4043_s3 = smov %s3164_s28  ;;  %s4044_s28 = smov %s3168_s29 }
0x1877   : > { %s4046_s30 = smov %s3500_s5  ;;  %44 = sbr.rel (!%p42_p5) target bundleno = 30 (0x1e), region = 213 }
0x187b   : > { %s4045_s29 = smov %s4042_s25 }
0x187e   :  { %2236 = vsyncpa [#allocation3], 1 }
0x187f   :  { %2238 = vsyncpa [#allocation3 + $0x1], 1 }
0x1880   :  { %2239 = vsyncpa [#allocation6], 1 }
0x1881   :  { %2241 = vsyncpa [#allocation6 + $0x1], 1 }
0x1882   :  { %2242 = vsyncpa [#allocation9], 1 }
0x1883   :  { %2243 = vsyncpa [#allocation12], 1 }
0x1884   :  { %2244 = vsyncpa [#allocation15], 1 }
0x1885   :  { %2245 = vsyncpa [#allocation4], 1 }
0x1886   :  { %2247 = vsyncpa [#allocation4 + $0x1], 1 }

</bundles_post_ra>
